<compile_context>
chip_gen: v5e
topology: v5e:2x2
jax: 0.10.0
libtpu: 0.0.40
codegen_flags: <defaults>
</compile_context>

<pallas_src>
import jax
import jax.numpy as jnp
from jax.experimental import pallas as pl
from jax.experimental.pallas import tpu as pltpu

IN_FEATURES = 10000
HIDDEN = 128
OUT_FEATURES = 2


def _mlp_kernel(x_ref, w1_ref, b1_ref, w2_ref, b2_ref, o_ref):
    # Cast the f32 x tile to bf16 on the VPU (ample slack: kernel is HBM-bound),
    # then fc1 on the MXU with f32 accumulation.
    x_bf = x_ref[...].astype(jnp.bfloat16)
    h = jnp.dot(x_bf, w1_ref[...], preferred_element_type=jnp.float32)
    h = jnp.maximum(h + b1_ref[...], 0.0)                      # bias + ReLU
    # fc2: (TM, 128) f32 @ (128, 2) f32 + (1, 2) — tiny, keep full f32.
    y = jnp.dot(h, w2_ref[...], preferred_element_type=jnp.float32)
    o_ref[...] = (y + b2_ref[...]).astype(o_ref.dtype)


def _vmem_capacity_bytes():
    # Hardware query only (not a compile-error fallback).  If it is
    # unavailable, assume the smallest per-core VMEM (v7x: 64 MiB).
    try:
        return int(pltpu.get_tpu_info().vmem_capacity_bytes)
    except Exception:
        return 64 << 20


def _estimate_vmem_bytes(tm):
    x_buf = 2 * tm * IN_FEATURES * 4           # f32 x tile, double-buffered
    x_cast = tm * IN_FEATURES * 2              # in-kernel bf16 cast temp
    w1_buf = 2 * IN_FEATURES * HIDDEN * 2      # resident bf16 w1 (2 buffers)
    h_tmp = tm * HIDDEN * 4                    # fc1 activation
    out_buf = 2 * tm * 128 * 4                 # (TM, 2) output, lane-padded
    small = 2 * (HIDDEN + HIDDEN * OUT_FEATURES + OUT_FEATURES) * 4
    return x_buf + x_cast + w1_buf + h_tmp + out_buf + small


def _pick_tm_cap(vmem_cap):
    budget = int(0.70 * vmem_cap)              # headroom for compiler scratch
    for tm in (1024, 768, 512, 384, 256, 128):
        if _estimate_vmem_bytes(tm) <= budget:
            return tm
    return 128


def _pick_tm(batch, tm_cap):
    if batch >= tm_cap:
        return tm_cap
    if batch < 8:
        return batch                            # block dim == full array dim
    if batch >= 32:
        return (batch // 32) * 32               # bf16 packs 2 rows / sublane
    return (batch // 8) * 8                     # sublane-aligned, never > batch


def _vmem_limit_bytes(tm, vmem_cap):
    want = _estimate_vmem_bytes(tm) + (24 << 20)
    ceiling = int(0.92 * vmem_cap)
    return int(max(min(want, ceiling), min(32 << 20, ceiling)))


def prepare_params(w1, b1, w2, b2):
    """One-time prep: w1 -> bf16 (VMEM-resident), biases -> (1, n) f32, w2 f32."""
    return (w1.astype(jnp.bfloat16),
            b1.reshape(1, HIDDEN).astype(jnp.float32),
            w2.astype(jnp.float32),
            b2.reshape(1, OUT_FEATURES).astype(jnp.float32))


def highres_nn_forward(x, params, tm=None):
    """x: (B, 10000) f32; params from prepare_params(); returns (B, 2) f32."""
    w1_bf, b1_2d, w2, b2_2d = params
    batch = x.shape[0]
    vmem_cap = _vmem_capacity_bytes()
    if tm is None:
        tm = _pick_tm(batch, _pick_tm_cap(vmem_cap))
    grid = (pl.cdiv(batch, tm),)
    const_map = lambda i: (0, 0)

    # TODO(synk): verify on v7x that this "parallel" batch axis actually shards
    # across both TensorCores; if not, switch it to pltpu.CORE_PARALLEL (or
    # drive the split via pl.core_map + create_tensorcore_mesh).
    return pl.pallas_call(
        _mlp_kernel,
        out_shape=jax.ShapeDtypeStruct((batch, OUT_FEATURES), jnp.float32),
        grid=grid,
        in_specs=[
            pl.BlockSpec((tm, IN_FEATURES), lambda i: (i, 0)),   # x streams
            pl.BlockSpec((IN_FEATURES, HIDDEN), const_map),      # w1 resident
            pl.BlockSpec((1, HIDDEN), const_map),                # b1 resident
            pl.BlockSpec((HIDDEN, OUT_FEATURES), const_map),     # w2 resident
            pl.BlockSpec((1, OUT_FEATURES), const_map),          # b2 resident
        ],
        out_specs=pl.BlockSpec((tm, OUT_FEATURES), lambda i: (i, 0)),
        compiler_params=pltpu.CompilerParams(
            dimension_semantics=("parallel",),
            vmem_limit_bytes=_vmem_limit_bytes(tm, vmem_cap),
        ),
    )(x, w1_bf, b1_2d, w2, b2_2d)


def init_params(key):
    """PyTorch nn.Linear-style init (uniform +/- 1/sqrt(fan_in)), f32."""
    k1, k2, k3, k4 = jax.random.split(key, 4)
    bound1 = 1.0 / jnp.sqrt(jnp.float32(IN_FEATURES))
    bound2 = 1.0 / jnp.sqrt(jnp.float32(HIDDEN))
    w1 = jax.random.uniform(k1, (IN_FEATURES, HIDDEN), jnp.float32, -bound1, bound1)
    b1 = jax.random.uniform(k2, (HIDDEN,), jnp.float32, -bound1, bound1)
    w2 = jax.random.uniform(k3, (HIDDEN, OUT_FEATURES), jnp.float32, -bound2, bound2)
    b2 = jax.random.uniform(k4, (OUT_FEATURES,), jnp.float32, -bound2, bound2)
    return w1, b1, w2, b2


if __name__ == "__main__":
    key = jax.random.PRNGKey(0)
    kx, kp = jax.random.split(key)
    batch = 8
    x = jax.random.normal(kx, (batch, IN_FEATURES), jnp.float32)
    w1, b1, w2, b2 = init_params(kp)

    params = prepare_params(w1, b1, w2, b2)
    out = highres_nn_forward(x, params)
    out = jax.block_until_ready(out)
    assert out.shape == (batch, OUT_FEATURES)

    # Reference with the same bf16 x/w1 inputs and f32 accumulation as the kernel.
    x_bf = x.astype(jnp.bfloat16)
    w1_bf = w1.astype(jnp.bfloat16)
    h_ref = jnp.maximum(
        jnp.dot(x_bf, w1_bf, preferred_element_type=jnp.float32) + b1, 0.0)
    ref = jnp.dot(h_ref, w2, preferred_element_type=jnp.float32) + b2
    assert jnp.allclose(out, ref, atol=2e-3, rtol=2e-3)

    # Sanity check vs. full-f32 math (loose tolerance for the bf16 cast).
    ref_f32 = jnp.maximum(x @ w1 + b1, 0.0) @ w2 + b2
    assert jnp.allclose(out, ref_f32, atol=5e-2, rtol=5e-2)

    print("KERNEL_OK")
</pallas_src>

<mosaic_0001>
module attributes {stable_mosaic.version = 11 : i64} {
  func.func @_mlp_kernel(%arg0: i32, %arg1: memref<8x10000xf32, #tpu.memory_space<vmem>>, %arg2: memref<10000x128xbf16, #tpu.memory_space<vmem>>, %arg3: memref<1x128xf32, #tpu.memory_space<vmem>>, %arg4: memref<128x2xf32, #tpu.memory_space<vmem>>, %arg5: memref<1x2xf32, #tpu.memory_space<vmem>>, %arg6: memref<8x2xf32, #tpu.memory_space<vmem>>) attributes {dimension_semantics = [#tpu.dimension_semantics<parallel>], iteration_bounds = array<i64: 1>, scalar_prefetch = 0 : i64, scratch_operands = 0 : i64, tpu.core_type = #tpu.core_type<tc>, window_params = [{transform_indices = @transform_0, window_bounds = array<i64: 8, 10000>}, {pipeline_mode = #tpu.pipeline_mode<synchronous>, transform_indices = @transform_1, window_bounds = array<i64: 10000, 128>}, {pipeline_mode = #tpu.pipeline_mode<synchronous>, transform_indices = @transform_2, window_bounds = array<i64: 1, 128>}, {pipeline_mode = #tpu.pipeline_mode<synchronous>, transform_indices = @transform_3, window_bounds = array<i64: 128, 2>}, {pipeline_mode = #tpu.pipeline_mode<synchronous>, transform_indices = @transform_4, window_bounds = array<i64: 1, 2>}, {transform_indices = @transform_5, window_bounds = array<i64: 8, 2>}]} {
    %c0 = arith.constant 0 : index
    %c0_0 = arith.constant 0 : index
    %0 = vector.load %arg1[%c0, %c0_0] : memref<8x10000xf32, #tpu.memory_space<vmem>>, vector<8x10000xf32>
    %1 = arith.truncf %0 : vector<8x10000xf32> to vector<8x10000xbf16>
    %c0_1 = arith.constant 0 : index
    %c0_2 = arith.constant 0 : index
    %2 = vector.load %arg2[%c0_1, %c0_2] : memref<10000x128xbf16, #tpu.memory_space<vmem>>, vector<10000x128xbf16>
    %cst = arith.constant dense<0.000000e+00> : vector<8x128xf32>
    %3 = tpu.matmul %1, %2, %cst {dimension_numbers = #tpu.dot_dimension_numbers<[1], [0], [0], [1], [0, 0, 1, 1], [], []>} : vector<8x10000xbf16>, vector<10000x128xbf16>, vector<8x128xf32> -> vector<8x128xf32>
    %c0_3 = arith.constant 0 : index
    %c0_4 = arith.constant 0 : index
    %4 = vector.load %arg3[%c0_3, %c0_4] : memref<1x128xf32, #tpu.memory_space<vmem>>, vector<1x128xf32>
    %5 = vector.broadcast %4 : vector<1x128xf32> to vector<8x128xf32>
    %6 = arith.addf %3, %5 : vector<8x128xf32>
    %cst_5 = arith.constant 0.000000e+00 : f32
    %7 = vector.broadcast %cst_5 : f32 to vector<8x128xf32>
    %8 = arith.maximumf %6, %7 : vector<8x128xf32>
    %c0_6 = arith.constant 0 : index
    %c0_7 = arith.constant 0 : index
    %9 = vector.load %arg4[%c0_6, %c0_7] : memref<128x2xf32, #tpu.memory_space<vmem>>, vector<128x2xf32>
    %cst_8 = arith.constant dense<0.000000e+00> : vector<8x2xf32>
    %10 = tpu.matmul %8, %9, %cst_8 {dimension_numbers = #tpu.dot_dimension_numbers<[1], [0], [0], [1], [0, 0, 1, 1], [], []>} : vector<8x128xf32>, vector<128x2xf32>, vector<8x2xf32> -> vector<8x2xf32>
    %c0_9 = arith.constant 0 : index
    %c0_10 = arith.constant 0 : index
    %11 = vector.load %arg5[%c0_9, %c0_10] : memref<1x2xf32, #tpu.memory_space<vmem>>, vector<1x2xf32>
    %12 = vector.broadcast %11 : vector<1x2xf32> to vector<8x2xf32>
    %13 = arith.addf %10, %12 : vector<8x2xf32>
    %c0_11 = arith.constant 0 : index
    %c0_12 = arith.constant 0 : index
    %14 = vector.load %arg6[%c0_11, %c0_12] : memref<8x2xf32, #tpu.memory_space<vmem>>, vector<8x2xf32>
    tpu.vector_store %arg6[%c0_11, %c0_12], %13 {strides = array<i32>} : memref<8x2xf32, #tpu.memory_space<vmem>>, vector<8x2xf32>,
    return
  }
  func.func @transform_0(%arg0: i32) -> (i32, i32) {
    %c0_i32 = arith.constant 0 : i32
    %c0_i32_0 = arith.constant 0 : i32
    return %arg0, %c0_i32 : i32, i32
  }
  func.func @transform_1(%arg0: i32) -> (i32, i32) {
    %c0_i32 = arith.constant 0 : i32
    %c0_i32_0 = arith.constant 0 : i32
    %c0_i32_1 = arith.constant 0 : i32
    return %c0_i32, %c0_i32_0 : i32, i32
  }
  func.func @transform_2(%arg0: i32) -> (i32, i32) {
    %c0_i32 = arith.constant 0 : i32
    %c0_i32_0 = arith.constant 0 : i32
    %c0_i32_1 = arith.constant 0 : i32
    return %c0_i32, %c0_i32_0 : i32, i32
  }
  func.func @transform_3(%arg0: i32) -> (i32, i32) {
    %c0_i32 = arith.constant 0 : i32
    %c0_i32_0 = arith.constant 0 : i32
    %c0_i32_1 = arith.constant 0 : i32
    return %c0_i32, %c0_i32_0 : i32, i32
  }
  func.func @transform_4(%arg0: i32) -> (i32, i32) {
    %c0_i32 = arith.constant 0 : i32
    %c0_i32_0 = arith.constant 0 : i32
    %c0_i32_1 = arith.constant 0 : i32
    return %c0_i32, %c0_i32_0 : i32, i32
  }
  func.func @transform_5(%arg0: i32) -> (i32, i32) {
    %c0_i32 = arith.constant 0 : i32
    %c0_i32_0 = arith.constant 0 : i32
    return %arg0, %c0_i32 : i32, i32
  }
}

</mosaic_0001>

<bundles_post_ra>
// kernel: tpu_custom_call.1
= control target key start
LH: loop header
LB: loop body
LE: loop exit
PB: predicated region body
PF: predicated region fallthrough
CT: control target
= control target key end

     0   :  { %10 = vsyncpa [#allocation3], 0  ;;  %s9689_s0 = inlined_call_operand.hbm [shape: f32[8,10000], index: 0, kind: input, shape index: {}]   ;;  %s9690_s1 = inlined_call_operand.hbm [shape: bf16[10000,128], index: 1, kind: input, shape index: {}]   ;;  %s9691_s2 = inlined_call_operand.hbm [shape: f32[1,128], index: 2, kind: input, shape index: {}]   ;;  %s9692_s3 = inlined_call_operand.vmem [shape: f32[128,2], index: 3, kind: input, shape index: {}]   ;;  %s9693_s4 = inlined_call_operand.hbm [shape: f32[1,2], index: 4, kind: input, shape index: {}]   ;;  %s9694_s5 = inlined_call_operand.vmem [shape: f32[8,2], index: 5, kind: output, shape index: {}]  }
   0x1   :  { %11 = vsyncpa [#allocation5], 0  ;;  %s28_s20 = sshll.u32 %s9690_s1, 4  ;;  %s29_s20 = int_to_ptr.hbm [resolvable:$true] %s28_s20 }
   0x2   :  { %12 = vsyncpa [#allocation8], 0  ;;  %s9557_s21 = smov [#allocation4]   ;;  %s18_s25 = sshll.u32 %s9689_s0, 4  ;;  %s19_s25 = int_to_ptr.hbm [resolvable:$true] %s18_s25 }
   0x3   :  { %s30_s22 = sshll.u32 %s9557_s21, 4  ;;  %s9558_s26 = smov 64   ;;  %s31_s22 = int_to_ptr.vmem [resolvable:$true] %s30_s22 }
   0x4   :  { %s9559_s27 = smov 4   ;;  %s9560_s28 = smov [#allocation2]  }
   0x5   :  { %36 = dma.hbm_to_vmem [thread:$0]  %s29_s20, 80000, %s31_s22, [#allocation5], %s9558_s26, %s9558_s26, %s9559_s27  }
   0x6   :  { %s20_s29 = sshll.u32 %s9560_s28, 4  ;;  %s42_s7 = sshll.u32 %s9691_s2, 4  ;;  %s21_s29 = int_to_ptr.vmem [resolvable:$true] %s20_s29  ;;  %s43_s7 = int_to_ptr.hbm [resolvable:$true] %s42_s7 }
   0x7   :  { %23 = dma.hbm_to_vmem [thread:$0]  %s19_s25, 10112, %s21_s29, [#allocation3]  }
   0x8   :  { %s55_s9 = sshll.u32 %s9693_s4, 4  ;;  %s9561_s10 = smov [#allocation6]   ;;  %s56_s9 = int_to_ptr.hbm [resolvable:$true] %s55_s9 }
   0x9   :  { %s44_s11 = sshll.u32 %s9561_s10, 4  ;;  %s9562_s0 = smov [#allocation7]   ;;  %s45_s11 = int_to_ptr.vmem [resolvable:$true] %s44_s11 }
   0xa   :  { %47 = dma.hbm_to_vmem [thread:$0]  %s43_s7, 16, %s45_s11, [#allocation5]  }
   0xb   :  { %s57_s12 = sshll.u32 %s9562_s0, 4  ;;  %s58_s12 = int_to_ptr.vmem [resolvable:$true] %s57_s12 }
   0xc   :  { %60 = dma.hbm_to_vmem [thread:$0]  %s56_s9, 16, %s58_s12, [#allocation8]  }
   0xd   :  { %9551 = dma.done.wait [#allocation3], 10112  }
   0xe   :  { %9552 = vsyncadd [#allocation3], 4294957184 }
   0xf   :  { %9553 = dma.done.wait [#allocation5], 80016  }
  0x10   :  { %9554 = vsyncadd [#allocation5], 4294887280 }
  0x11   :  { %9555 = dma.done.wait [#allocation8], 16  }
  0x12   :  { %9556 = vsyncadd [#allocation8], 4294967280  ;;  %v8829_v0 = vld [vmem:[#allocation4 + $0x38] sm:$0xff]  ;;  %v8828_v4 = vld [vmem:[#allocation4 + $0x30] sm:$0xff]  ;;  %vm5240_vm0 = vcmask 130048   ;;  %vm6312_vm1 = vcmask 15360  }
  0x13   :  { %v8837_v1 = vld [vmem:[#allocation4 + $0x78] sm:$0xff]  ;;  %5244 = vmatpush.bf16.msra.mxu0 %v8829_v0  ;;  %v8836_v5 = vld [vmem:[#allocation4 + $0x70] sm:$0xff]  ;;  %v8827_v8 = vld [vmem:[#allocation4 + $0x28] sm:$0xff] }
  0x14   :  { %v8845_v2 = vld [vmem:[#allocation4 + $0xb8] sm:$0xff]  ;;  %5257 = vmatpush.bf16.msra.mxu1 %v8837_v1  ;;  %v8844_v6 = vld [vmem:[#allocation4 + $0xb0] sm:$0xff]  ;;  %v8835_v9 = vld [vmem:[#allocation4 + $0x68] sm:$0xff] }
  0x15   :  { %v8853_v3 = vld [vmem:[#allocation4 + $0xf8] sm:$0xff]  ;;  %5270 = vmatpush.bf16.msra.mxu2 %v8845_v2  ;;  %v8852_v7 = vld [vmem:[#allocation4 + $0xf0] sm:$0xff]  ;;  %v8843_v10 = vld [vmem:[#allocation4 + $0xa8] sm:$0xff] }
  0x16   :  { %5283 = vmatpush.bf16.msra.mxu3 %v8853_v3  ;;  %v8851_v11 = vld [vmem:[#allocation4 + $0xe8] sm:$0xff]  ;;  %v8826_v12 = vld [vmem:[#allocation4 + $0x20] sm:$0xff]  ;;  %v8825_v16 = vld [vmem:[#allocation4 + $0x18] sm:$0xff] }
  0x17   :  { %5245 = vmatpush.bf16.msra.mxu0 %v8828_v4  ;;  %v8834_v13 = vld [vmem:[#allocation4 + $0x60] sm:$0xff]  ;;  %v8833_v17 = vld [vmem:[#allocation4 + $0x58] sm:$0xff]  ;;  %v8824_v20 = vld [vmem:[#allocation4 + $0x10] sm:$0xff] }
  0x18   :  { %5258 = vmatpush.bf16.msra.mxu1 %v8836_v5  ;;  %v8842_v14 = vld [vmem:[#allocation4 + $0xa0] sm:$0xff]  ;;  %v8841_v18 = vld [vmem:[#allocation4 + $0x98] sm:$0xff]  ;;  %v8832_v21 = vld [vmem:[#allocation4 + $0x50] sm:$0xff] }
  0x19   :  { %5271 = vmatpush.bf16.msra.mxu2 %v8844_v6  ;;  %v8850_v15 = vld [vmem:[#allocation4 + $0xe0] sm:$0xff]  ;;  %v8849_v19 = vld [vmem:[#allocation4 + $0xd8] sm:$0xff]  ;;  %v8840_v22 = vld [vmem:[#allocation4 + $0x90] sm:$0xff] }
  0x1a   :  { %5284 = vmatpush.bf16.msra.mxu3 %v8852_v7  ;;  %v8848_v23 = vld [vmem:[#allocation4 + $0xd0] sm:$0xff]  ;;  %v8823_v24 = vld [vmem:[#allocation4 + $0x8] sm:$0xff]  ;;  %v8822_v28 = vld [vmem:[#allocation4] sm:$0xff] }
  0x1b   :  { %5246 = vmatpush.bf16.msra.mxu0 %v8827_v8  ;;  %v8831_v25 = vld [vmem:[#allocation4 + $0x48] sm:$0xff]  ;;  %v8830_v29 = vld [vmem:[#allocation4 + $0x40] sm:$0xff]  ;;  %v8861_v32 = vld [vmem:[#allocation4 + $0x138] sm:$0xff] }
  0x1c   :  { %5259 = vmatpush.bf16.msra.mxu1 %v8835_v9  ;;  %v8839_v26 = vld [vmem:[#allocation4 + $0x88] sm:$0xff]  ;;  %v8838_v31 = vld [vmem:[#allocation4 + $0x80] sm:$0xff]  ;;  %v80_v33 = vld [vmem:[#allocation2 + $0x10] sm:$0xff] }
  0x1d   :  { %5272 = vmatpush.bf16.msra.mxu2 %v8843_v10  ;;  %v8847_v27 = vld [vmem:[#allocation4 + $0xc8] sm:$0xff]  ;;  %v8869_v34 = vld [vmem:[#allocation4 + $0x178] sm:$0xff]  ;;  %v79_v36 = vld [vmem:[#allocation2 + $0x8] sm:$0xff]  ;;  %v159_v40 = vpack.c.bf16 %v80_v33, %v80_v33 }
  0x1e   :  { %5285 = vmatpush.bf16.msra.mxu3 %v8851_v11  ;;  %v78_v30 = vld [vmem:[#allocation2] sm:$0xff]  ;;  %v8877_v35 = vld [vmem:[#allocation4 + $0x1b8] sm:$0xff]  ;;  %v8846_v37 = vld [vmem:[#allocation4 + $0xc0] sm:$0xff]  ;;  %v158_v43 = vpack.c.bf16 %v79_v36, %v79_v36 }
  0x1f   :  { %5247 = vmatpush.bf16.msra.mxu0 %v8826_v12  ;;  %v157_v38 = vpack.c.bf16 %v78_v30, %v78_v30  ;;  %v8885_v39 = vld [vmem:[#allocation4 + $0x1f8] sm:$0xff]  ;;  %v81_v41 = vld [vmem:[#allocation2 + $0x18] sm:$0xff]  ;;  %v8860_v42 = vld [vmem:[#allocation4 + $0x130] sm:$0xff] }
  0x20   :  { %5260 = vmatpush.bf16.msra.mxu1 %v8834_v13  ;;  %v8868_v44 = vld [vmem:[#allocation4 + $0x170] sm:$0xff]  ;;  %v160_v46 = vpack.c.bf16 %v81_v41, %v81_v41  ;;  %v8859_v48 = vld [vmem:[#allocation4 + $0x128] sm:$0xff]  ;;  %v8858_v52 = vld [vmem:[#allocation4 + $0x120] sm:$0xff] }
  0x21   :  { %5273 = vmatpush.bf16.msra.mxu2 %v8842_v14  ;;  %v8876_v45 = vld [vmem:[#allocation4 + $0x1b0] sm:$0xff]  ;;  %v8867_v49 = vld [vmem:[#allocation4 + $0x168] sm:$0xff]  ;;  %v8866_v53 = vld [vmem:[#allocation4 + $0x160] sm:$0xff] }
  0x22   :  { %5286 = vmatpush.bf16.msra.mxu3 %v8850_v15  ;;  %v8884_v47 = vld [vmem:[#allocation4 + $0x1f0] sm:$0xff]  ;;  %v8875_v50 = vld [vmem:[#allocation4 + $0x1a8] sm:$0xff]  ;;  %v8874_v54 = vld [vmem:[#allocation4 + $0x1a0] sm:$0xff] }
  0x23   :  { %5248 = vmatpush.bf16.msra.mxu0 %v8825_v16  ;;  %v8883_v51 = vld [vmem:[#allocation4 + $0x1e8] sm:$0xff]  ;;  %v8882_v55 = vld [vmem:[#allocation4 + $0x1e0] sm:$0xff]  ;;  %v8857_v56 = vld [vmem:[#allocation4 + $0x118] sm:$0xff] }
  0x24   :  { %5261 = vmatpush.bf16.msra.mxu1 %v8833_v17  ;;  %v8865_v57 = vld [vmem:[#allocation4 + $0x158] sm:$0xff]  ;;  %v8856_v60 = vld [vmem:[#allocation4 + $0x110] sm:$0xff]  ;;  %v8855_v0 = vld [vmem:[#allocation4 + $0x108] sm:$0xff] }
  0x25   :  { %5274 = vmatpush.bf16.msra.mxu2 %v8841_v18  ;;  %v8873_v58 = vld [vmem:[#allocation4 + $0x198] sm:$0xff]  ;;  %v8864_v61 = vld [vmem:[#allocation4 + $0x150] sm:$0xff]  ;;  %v8863_v1 = vld [vmem:[#allocation4 + $0x148] sm:$0xff] }
  0x26   :  { %5287 = vmatpush.bf16.msra.mxu3 %v8849_v19  ;;  %v8881_v59 = vld [vmem:[#allocation4 + $0x1d8] sm:$0xff]  ;;  %v8872_v62 = vld [vmem:[#allocation4 + $0x190] sm:$0xff]  ;;  %v8871_v2 = vld [vmem:[#allocation4 + $0x188] sm:$0xff] }
  0x27   :  { %5249 = vmatpush.bf16.msra.mxu0 %v8824_v20  ;;  %v8880_v63 = vld [vmem:[#allocation4 + $0x1d0] sm:$0xff]  ;;  %v8879_v3 = vld [vmem:[#allocation4 + $0x1c8] sm:$0xff]  ;;  %v8854_v4 = vld [vmem:[#allocation4 + $0x100] sm:$0xff] }
  0x28   :  { %5262 = vmatpush.bf16.msra.mxu1 %v8832_v21  ;;  %v8862_v5 = vld [vmem:[#allocation4 + $0x140] sm:$0xff]  ;;  %v8893_v7 = vld [vmem:[#allocation4 + $0x238] sm:$0xff]  ;;  %v82_v10 = vld [vmem:[#allocation2 + $0x20] sm:$0xff] }
  0x29   :  { %5275 = vmatpush.bf16.msra.mxu2 %v8840_v22  ;;  %v8870_v6 = vld [vmem:[#allocation4 + $0x180] sm:$0xff]  ;;  %v84_v8 = vld [vmem:[#allocation2 + $0x30] sm:$0xff]  ;;  %v83_v11 = vld [vmem:[#allocation2 + $0x28] sm:$0xff]  ;;  %v161_v17 = vpack.c.bf16 %v82_v10, %v82_v10 }
  0x2a   :  { %5288 = vmatpush.bf16.msra.mxu3 %v8848_v23  ;;  %v8901_v9 = vld [vmem:[#allocation4 + $0x278] sm:$0xff]  ;;  %v8878_v13 = vld [vmem:[#allocation4 + $0x1c0] sm:$0xff]  ;;  %v163_v15 = vpack.c.bf16 %v84_v8, %v84_v8  ;;  %v162_v18 = vpack.c.bf16 %v83_v11, %v83_v11  ;;  %v8892_v19 = vld [vmem:[#allocation4 + $0x230] sm:$0xff] }
  0x2b   :  { %5250 = vmatpush.bf16.msra.mxu0 %v8823_v24  ;;  %v8909_v12 = vld [vmem:[#allocation4 + $0x2b8] sm:$0xff]  ;;  %v85_v16 = vld [vmem:[#allocation2 + $0x38] sm:$0xff]  ;;  %v8900_v20 = vld [vmem:[#allocation4 + $0x270] sm:$0xff] }
  0x2c   :  { %5263 = vmatpush.bf16.msra.mxu1 %v8831_v25  ;;  %v8917_v14 = vld [vmem:[#allocation4 + $0x2f8] sm:$0xff]  ;;  %v8908_v21 = vld [vmem:[#allocation4 + $0x2b0] sm:$0xff]  ;;  %v164_v22 = vpack.c.bf16 %v85_v16, %v85_v16  ;;  %v8891_v24 = vld [vmem:[#allocation4 + $0x228] sm:$0xff] }
  0x2d   :  { %5276 = vmatpush.bf16.msra.mxu2 %v8839_v26  ;;  %v8916_v23 = vld [vmem:[#allocation4 + $0x2f0] sm:$0xff]  ;;  %v8899_v25 = vld [vmem:[#allocation4 + $0x268] sm:$0xff]  ;;  %v8906_v30 = vld [vmem:[#allocation4 + $0x2a0] sm:$0xff] }
  0x2e   :  { %5289 = vmatpush.bf16.msra.mxu3 %v8847_v27  ;;  %v8907_v26 = vld [vmem:[#allocation4 + $0x2a8] sm:$0xff]  ;;  %v8897_v33 = vld [vmem:[#allocation4 + $0x258] sm:$0xff]  ;;  %v8888_v36 = vld [vmem:[#allocation4 + $0x210] sm:$0xff] }
  0x2f   :  { %5251 = vmatpush.bf16.msra.mxu0 %v8822_v28  ;;  %v8915_v27 = vld [vmem:[#allocation4 + $0x2e8] sm:$0xff]  ;;  %v8890_v28 = vld [vmem:[#allocation4 + $0x220] sm:$0xff]  ;;  %v8921_v8 = vld [vmem:[#allocation4 + $0x318] sm:$0xff] }
  0x30   :  { %5264 = vmatpush.bf16.msra.mxu1 %v8830_v29  ;;  %v8898_v29 = vld [vmem:[#allocation4 + $0x260] sm:$0xff]  ;;  %v8895_v41 = vld [vmem:[#allocation4 + $0x248] sm:$0xff]  ;;  %v8937_v10 = vld [vmem:[#allocation4 + $0x398] sm:$0xff] }
  0x31   :  { %5277 = vmatpush.bf16.msra.mxu2 %v8838_v31  ;;  %v8914_v31 = vld [vmem:[#allocation4 + $0x2e0] sm:$0xff]  ;;  %v8945_v11 = vld [vmem:[#allocation4 + $0x3d8] sm:$0xff]  ;;  %v8919_v16 = vld [vmem:[#allocation4 + $0x308] sm:$0xff] }
  0x32   :  { %5290 = vmatpush.bf16.msra.mxu3 %v8846_v37  ;;  %5252 = vmatmul.bf16.vlgmr.msra.gmra.mxu0 %v157_v38  ;;  %v8896_v37 = vld [vmem:[#allocation4 + $0x250] sm:$0xff] }
  0x33   :  { %5296 = vmatpush.bf16.msrb.mxu0 %v8861_v32  ;;  %5265 = vmatmul.bf16.vlgmr.msra.gmra.mxu1 %v158_v43  ;;  %v8889_v32 = vld [vmem:[#allocation4 + $0x218] sm:$0xff]  ;;  %v8904_v38 = vld [vmem:[#allocation4 + $0x290] sm:$0xff]  ;;  %v8911_v43 = vld [vmem:[#allocation4 + $0x2c8] sm:$0xff] }
  0x34   :  { %5309 = vmatpush.bf16.msrb.mxu1 %v8869_v34  ;;  %5278 = vmatmul.bf16.vlgmr.msra.gmra.mxu2 %v159_v40  ;;  %v8905_v34 = vld [vmem:[#allocation4 + $0x298] sm:$0xff]  ;;  %v8887_v40 = vld [vmem:[#allocation4 + $0x208] sm:$0xff] }
  0x35   :  { %5322 = vmatpush.bf16.msrb.mxu2 %v8877_v35  ;;  %5291 = vmatmul.bf16.vlgmr.msra.gmra.mxu3 %v160_v46  ;;  %v8913_v35 = vld [vmem:[#allocation4 + $0x2d8] sm:$0xff]  ;;  %v86_v46 = vld [vmem:[#allocation2 + $0x40] sm:$0xff] }
  0x36   :  { %5335 = vmatpush.bf16.msrb.mxu3 %v8885_v39  ;;  %v8912_v39 = vld [vmem:[#allocation4 + $0x2d0] sm:$0xff] }
  0x37   :  { %5297 = vmatpush.bf16.msrb.mxu0 %v8860_v42  ;;  %v8903_v42 = vld [vmem:[#allocation4 + $0x288] sm:$0xff] }
  0x38   :  { %5310 = vmatpush.bf16.msrb.mxu1 %v8868_v44  ;;  %v8886_v44 = vld [vmem:[#allocation4 + $0x200] sm:$0xff] }
  0x39   :  { %5323 = vmatpush.bf16.msrb.mxu2 %v8876_v45  ;;  %v8894_v45 = vld [vmem:[#allocation4 + $0x240] sm:$0xff] }
  0x3a   :  { %5336 = vmatpush.bf16.msrb.mxu3 %v8884_v47  ;;  %v8902_v47 = vld [vmem:[#allocation4 + $0x280] sm:$0xff] }
  0x3b   :  { %5298 = vmatpush.bf16.msrb.mxu0 %v8859_v48  ;;  %v8925_v48 = vld [vmem:[#allocation4 + $0x338] sm:$0xff] }
  0x3c   :  { %5311 = vmatpush.bf16.msrb.mxu1 %v8867_v49  ;;  %v88_v49 = vld [vmem:[#allocation2 + $0x50] sm:$0xff] }
  0x3d   :  { %5324 = vmatpush.bf16.msrb.mxu2 %v8875_v50  ;;  %v8933_v50 = vld [vmem:[#allocation4 + $0x378] sm:$0xff] }
  0x3e   :  { %5337 = vmatpush.bf16.msrb.mxu3 %v8883_v51  ;;  %v8941_v51 = vld [vmem:[#allocation4 + $0x3b8] sm:$0xff] }
  0x3f   :  { %5299 = vmatpush.bf16.msrb.mxu0 %v8858_v52  ;;  %v87_v52 = vld [vmem:[#allocation2 + $0x48] sm:$0xff] }
  0x40   :  { %5312 = vmatpush.bf16.msrb.mxu1 %v8866_v53  ;;  %v8910_v53 = vld [vmem:[#allocation4 + $0x2c0] sm:$0xff] }
  0x41   :  { %5325 = vmatpush.bf16.msrb.mxu2 %v8874_v54  ;;  %v165_v54 = vpack.c.bf16 %v86_v46, %v86_v46  ;;  %v8970_v46 = vld [vmem:[#allocation4 + $0x4a0] sm:$0xff] }
  0x42   :  { %5338 = vmatpush.bf16.msrb.mxu3 %v8882_v55  ;;  %v89_v55 = vld [vmem:[#allocation2 + $0x58] sm:$0xff] }
  0x43   :  { %5300 = vmatpush.bf16.msrb.mxu0 %v8857_v56  ;;  %v167_v56 = vpack.c.bf16 %v88_v49, %v88_v49  ;;  %v8961_v49 = vld [vmem:[#allocation4 + $0x458] sm:$0xff] }
  0x44   :  { %5313 = vmatpush.bf16.msrb.mxu1 %v8865_v57  ;;  %v8949_v57 = vld [vmem:[#allocation4 + $0x3f8] sm:$0xff] }
  0x45   :  { %5326 = vmatpush.bf16.msrb.mxu2 %v8873_v58  ;;  %v166_v58 = vpack.c.bf16 %v87_v52, %v87_v52  ;;  %v8952_v52 = vld [vmem:[#allocation4 + $0x410] sm:$0xff] }
  0x46   :  { %5339 = vmatpush.bf16.msrb.mxu3 %v8881_v59  ;;  %v8924_v59 = vld [vmem:[#allocation4 + $0x330] sm:$0xff] }
  0x47   :  { %5301 = vmatpush.bf16.msrb.mxu0 %v8856_v60  ;;  %v168_v60 = vpack.c.bf16 %v89_v55, %v89_v55  ;;  %v8976_v55 = vld [vmem:[#allocation4 + $0x4d0] sm:$0xff] }
  0x48   :  { %5314 = vmatpush.bf16.msrb.mxu1 %v8864_v61  ;;  %v8932_v61 = vld [vmem:[#allocation4 + $0x370] sm:$0xff] }
  0x49   :  { %5327 = vmatpush.bf16.msrb.mxu2 %v8872_v62  ;;  %v8940_v62 = vld [vmem:[#allocation4 + $0x3b0] sm:$0xff] }
  0x4a   :  { %5340 = vmatpush.bf16.msrb.mxu3 %v8880_v63  ;;  %v8948_v63 = vld [vmem:[#allocation4 + $0x3f0] sm:$0xff] }
  0x4b   :  { %5302 = vmatpush.bf16.msrb.mxu0 %v8855_v0  ;;  %v8923_v0 = vld [vmem:[#allocation4 + $0x328] sm:$0xff] }
  0x4c   :  { %5315 = vmatpush.bf16.msrb.mxu1 %v8863_v1  ;;  %v8931_v1 = vld [vmem:[#allocation4 + $0x368] sm:$0xff] }
  0x4d   :  { %5328 = vmatpush.bf16.msrb.mxu2 %v8871_v2  ;;  %v8939_v2 = vld [vmem:[#allocation4 + $0x3a8] sm:$0xff] }
  0x4e   :  { %5341 = vmatpush.bf16.msrb.mxu3 %v8879_v3  ;;  %v8947_v3 = vld [vmem:[#allocation4 + $0x3e8] sm:$0xff] }
  0x4f   :  { %5303 = vmatpush.bf16.msrb.mxu0 %v8854_v4  ;;  %v8922_v4 = vld [vmem:[#allocation4 + $0x320] sm:$0xff] }
  0x50   :  { %5316 = vmatpush.bf16.msrb.mxu1 %v8862_v5  ;;  %v8930_v5 = vld [vmem:[#allocation4 + $0x360] sm:$0xff] }
  0x51   :  { %5329 = vmatpush.bf16.msrb.mxu2 %v8870_v6  ;;  %v8938_v6 = vld [vmem:[#allocation4 + $0x3a0] sm:$0xff] }
  0x52   :  { %5342 = vmatpush.bf16.msrb.mxu3 %v8878_v13  ;;  %5304 = vmatmul.bf16.vlgmr.msrb.gmra.mxu0 %v161_v17  ;;  %v8928_v13 = vld [vmem:[#allocation4 + $0x350] sm:$0xff]  ;;  %v8927_v17 = vld [vmem:[#allocation4 + $0x348] sm:$0xff] }
  0x53   :  { %5348 = vmatpush.bf16.msra.mxu0 %v8893_v7  ;;  %5317 = vmatmul.bf16.vlgmr.msrb.gmra.mxu1 %v162_v18  ;;  %v8946_v7 = vld [vmem:[#allocation4 + $0x3e0] sm:$0xff]  ;;  %v8935_v18 = vld [vmem:[#allocation4 + $0x388] sm:$0xff] }
  0x54   :  { %5361 = vmatpush.bf16.msra.mxu1 %v8901_v9  ;;  %5330 = vmatmul.bf16.vlgmr.msrb.gmra.mxu2 %v163_v15  ;;  %v8929_v9 = vld [vmem:[#allocation4 + $0x358] sm:$0xff]  ;;  %v8944_v15 = vld [vmem:[#allocation4 + $0x3d0] sm:$0xff] }
  0x55   :  { %5374 = vmatpush.bf16.msra.mxu2 %v8909_v12  ;;  %5343 = vmatmul.bf16.vlgmr.msrb.gmra.mxu3 %v164_v22  ;;  %v8920_v12 = vld [vmem:[#allocation4 + $0x310] sm:$0xff]  ;;  %v8934_v22 = vld [vmem:[#allocation4 + $0x380] sm:$0xff] }
  0x56   :  { %5387 = vmatpush.bf16.msra.mxu3 %v8917_v14  ;;  %v8936_v14 = vld [vmem:[#allocation4 + $0x390] sm:$0xff] }
  0x57   :  { %5349 = vmatpush.bf16.msra.mxu0 %v8892_v19  ;;  %v8943_v19 = vld [vmem:[#allocation4 + $0x3c8] sm:$0xff] }
  0x58   :  { %5362 = vmatpush.bf16.msra.mxu1 %v8900_v20  ;;  %v8918_v20 = vld [vmem:[#allocation4 + $0x300] sm:$0xff] }
  0x59   :  { %5375 = vmatpush.bf16.msra.mxu2 %v8908_v21  ;;  %v8926_v21 = vld [vmem:[#allocation4 + $0x340] sm:$0xff] }
  0x5a   :  { %5388 = vmatpush.bf16.msra.mxu3 %v8916_v23  ;;  %v8957_v23 = vld [vmem:[#allocation4 + $0x438] sm:$0xff] }
  0x5b   :  { %5350 = vmatpush.bf16.msra.mxu0 %v8891_v24  ;;  %v90_v24 = vld [vmem:[#allocation2 + $0x60] sm:$0xff] }
  0x5c   :  { %5363 = vmatpush.bf16.msra.mxu1 %v8899_v25  ;;  %v8965_v25 = vld [vmem:[#allocation4 + $0x478] sm:$0xff] }
  0x5d   :  { %5376 = vmatpush.bf16.msra.mxu2 %v8907_v26  ;;  %v92_v26 = vld [vmem:[#allocation2 + $0x70] sm:$0xff] }
  0x5e   :  { %5389 = vmatpush.bf16.msra.mxu3 %v8915_v27  ;;  %v91_v27 = vld [vmem:[#allocation2 + $0x68] sm:$0xff] }
  0x5f   :  { %5351 = vmatpush.bf16.msra.mxu0 %v8890_v28  ;;  %v8973_v28 = vld [vmem:[#allocation4 + $0x4b8] sm:$0xff] }
  0x60   :  { %5364 = vmatpush.bf16.msra.mxu1 %v8898_v29  ;;  %v8942_v29 = vld [vmem:[#allocation4 + $0x3c0] sm:$0xff] }
  0x61   :  { %5377 = vmatpush.bf16.msra.mxu2 %v8906_v30  ;;  %v93_v30 = vld [vmem:[#allocation2 + $0x78] sm:$0xff] }
  0x62   :  { %5390 = vmatpush.bf16.msra.mxu3 %v8914_v31  ;;  %v169_v31 = vpack.c.bf16 %v90_v24, %v90_v24  ;;  %v9002_v24 = vld [vmem:[#allocation4 + $0x5a0] sm:$0xff] }
  0x63   :  { %5352 = vmatpush.bf16.msra.mxu0 %v8889_v32  ;;  %v8981_v32 = vld [vmem:[#allocation4 + $0x4f8] sm:$0xff] }
  0x64   :  { %5365 = vmatpush.bf16.msra.mxu1 %v8897_v33  ;;  %v171_v33 = vpack.c.bf16 %v92_v26, %v92_v26 }
  0x65   :  { %5378 = vmatpush.bf16.msra.mxu2 %v8905_v34  ;;  %v170_v34 = vpack.c.bf16 %v91_v27, %v91_v27  ;;  %v9010_v27 = vld [vmem:[#allocation4 + $0x5e0] sm:$0xff] }
  0x66   :  { %5391 = vmatpush.bf16.msra.mxu3 %v8913_v35  ;;  %v172_v35 = vpack.c.bf16 %v93_v30, %v93_v30  ;;  %v8993_v30 = vld [vmem:[#allocation4 + $0x558] sm:$0xff] }
  0x67   :  { %5353 = vmatpush.bf16.msra.mxu0 %v8888_v36  ;;  %v8956_v36 = vld [vmem:[#allocation4 + $0x430] sm:$0xff] }
  0x68   :  { %5366 = vmatpush.bf16.msra.mxu1 %v8896_v37  ;;  %v8964_v37 = vld [vmem:[#allocation4 + $0x470] sm:$0xff] }
  0x69   :  { %5379 = vmatpush.bf16.msra.mxu2 %v8904_v38  ;;  %v8972_v38 = vld [vmem:[#allocation4 + $0x4b0] sm:$0xff] }
  0x6a   :  { %5392 = vmatpush.bf16.msra.mxu3 %v8912_v39  ;;  %v8980_v39 = vld [vmem:[#allocation4 + $0x4f0] sm:$0xff] }
  0x6b   :  { %5354 = vmatpush.bf16.msra.mxu0 %v8887_v40  ;;  %v8955_v40 = vld [vmem:[#allocation4 + $0x428] sm:$0xff] }
  0x6c   :  { %5367 = vmatpush.bf16.msra.mxu1 %v8895_v41  ;;  %v8963_v41 = vld [vmem:[#allocation4 + $0x468] sm:$0xff] }
  0x6d   :  { %5380 = vmatpush.bf16.msra.mxu2 %v8903_v42  ;;  %v8971_v42 = vld [vmem:[#allocation4 + $0x4a8] sm:$0xff] }
  0x6e   :  { %5393 = vmatpush.bf16.msra.mxu3 %v8911_v43  ;;  %v8979_v43 = vld [vmem:[#allocation4 + $0x4e8] sm:$0xff] }
  0x6f   :  { %5355 = vmatpush.bf16.msra.mxu0 %v8886_v44  ;;  %v8954_v44 = vld [vmem:[#allocation4 + $0x420] sm:$0xff] }
  0x70   :  { %5368 = vmatpush.bf16.msra.mxu1 %v8894_v45  ;;  %v8962_v45 = vld [vmem:[#allocation4 + $0x460] sm:$0xff] }
  0x71   :  { %5381 = vmatpush.bf16.msra.mxu2 %v8902_v47  ;;  %v8978_v47 = vld [vmem:[#allocation4 + $0x4e0] sm:$0xff] }
  0x72   :  { %5394 = vmatpush.bf16.msra.mxu3 %v8910_v53  ;;  %5356 = vmatmul.bf16.vlgmr.msra.gmra.mxu0 %v165_v54  ;;  %v8960_v53 = vld [vmem:[#allocation4 + $0x450] sm:$0xff] }
  0x73   :  { %5400 = vmatpush.bf16.msrb.mxu0 %v8925_v48  ;;  %5369 = vmatmul.bf16.vlgmr.msra.gmra.mxu1 %v166_v58  ;;  %v8953_v48 = vld [vmem:[#allocation4 + $0x418] sm:$0xff]  ;;  %v8968_v54 = vld [vmem:[#allocation4 + $0x490] sm:$0xff]  ;;  %v8967_v58 = vld [vmem:[#allocation4 + $0x488] sm:$0xff] }
  0x74   :  { %5413 = vmatpush.bf16.msrb.mxu1 %v8933_v50  ;;  %5382 = vmatmul.bf16.vlgmr.msra.gmra.mxu2 %v167_v56  ;;  %v8969_v50 = vld [vmem:[#allocation4 + $0x498] sm:$0xff]  ;;  %v8951_v56 = vld [vmem:[#allocation4 + $0x408] sm:$0xff] }
  0x75   :  { %5426 = vmatpush.bf16.msrb.mxu2 %v8941_v51  ;;  %5395 = vmatmul.bf16.vlgmr.msra.gmra.mxu3 %v168_v60  ;;  %v8977_v51 = vld [vmem:[#allocation4 + $0x4d8] sm:$0xff]  ;;  %v8950_v60 = vld [vmem:[#allocation4 + $0x400] sm:$0xff] }
  0x76   :  { %5439 = vmatpush.bf16.msrb.mxu3 %v8949_v57  ;;  %v8959_v57 = vld [vmem:[#allocation4 + $0x448] sm:$0xff] }
  0x77   :  { %5401 = vmatpush.bf16.msrb.mxu0 %v8924_v59  ;;  %v8975_v59 = vld [vmem:[#allocation4 + $0x4c8] sm:$0xff] }
  0x78   :  { %5414 = vmatpush.bf16.msrb.mxu1 %v8932_v61  ;;  %v8958_v61 = vld [vmem:[#allocation4 + $0x440] sm:$0xff] }
  0x79   :  { %5427 = vmatpush.bf16.msrb.mxu2 %v8940_v62  ;;  %v8966_v62 = vld [vmem:[#allocation4 + $0x480] sm:$0xff] }
  0x7a   :  { %5440 = vmatpush.bf16.msrb.mxu3 %v8948_v63  ;;  %v94_v63 = vld [vmem:[#allocation2 + $0x80] sm:$0xff] }
  0x7b   :  { %5402 = vmatpush.bf16.msrb.mxu0 %v8923_v0  ;;  %v96_v0 = vld [vmem:[#allocation2 + $0x90] sm:$0xff] }
  0x7c   :  { %5415 = vmatpush.bf16.msrb.mxu1 %v8931_v1  ;;  %v8989_v1 = vld [vmem:[#allocation4 + $0x538] sm:$0xff] }
  0x7d   :  { %5428 = vmatpush.bf16.msrb.mxu2 %v8939_v2  ;;  %v8997_v2 = vld [vmem:[#allocation4 + $0x578] sm:$0xff] }
  0x7e   :  { %5441 = vmatpush.bf16.msrb.mxu3 %v8947_v3  ;;  %v95_v3 = vld [vmem:[#allocation2 + $0x88] sm:$0xff] }
  0x7f   :  { %5403 = vmatpush.bf16.msrb.mxu0 %v8922_v4  ;;  %v9005_v4 = vld [vmem:[#allocation4 + $0x5b8] sm:$0xff] }
  0x80   :  { %5416 = vmatpush.bf16.msrb.mxu1 %v8930_v5  ;;  %v8974_v5 = vld [vmem:[#allocation4 + $0x4c0] sm:$0xff] }
  0x81   :  { %5429 = vmatpush.bf16.msrb.mxu2 %v8938_v6  ;;  %v97_v6 = vld [vmem:[#allocation2 + $0x98] sm:$0xff] }
  0x82   :  { %5442 = vmatpush.bf16.msrb.mxu3 %v8946_v7  ;;  %v173_v7 = vpack.c.bf16 %v94_v63, %v94_v63 }
  0x83   :  { %5404 = vmatpush.bf16.msrb.mxu0 %v8921_v8  ;;  %v175_v8 = vpack.c.bf16 %v96_v0, %v96_v0 }
  0x84   :  { %5417 = vmatpush.bf16.msrb.mxu1 %v8929_v9  ;;  %v9013_v9 = vld [vmem:[#allocation4 + $0x5f8] sm:$0xff] }
  0x85   :  { %5430 = vmatpush.bf16.msrb.mxu2 %v8937_v10  ;;  %v174_v10 = vpack.c.bf16 %v95_v3, %v95_v3  ;;  %v9036_v3 = vld [vmem:[#allocation4 + $0x6b0] sm:$0xff] }
  0x86   :  { %5443 = vmatpush.bf16.msrb.mxu3 %v8945_v11  ;;  %v176_v11 = vpack.c.bf16 %v97_v6, %v97_v6  ;;  %v9027_v6 = vld [vmem:[#allocation4 + $0x668] sm:$0xff] }
  0x87   :  { %5405 = vmatpush.bf16.msrb.mxu0 %v8920_v12  ;;  %v8988_v12 = vld [vmem:[#allocation4 + $0x530] sm:$0xff] }
  0x88   :  { %5418 = vmatpush.bf16.msrb.mxu1 %v8928_v13  ;;  %v8996_v13 = vld [vmem:[#allocation4 + $0x570] sm:$0xff] }
  0x89   :  { %5431 = vmatpush.bf16.msrb.mxu2 %v8936_v14  ;;  %v9004_v14 = vld [vmem:[#allocation4 + $0x5b0] sm:$0xff] }
  0x8a   :  { %5444 = vmatpush.bf16.msrb.mxu3 %v8944_v15  ;;  %v9012_v15 = vld [vmem:[#allocation4 + $0x5f0] sm:$0xff] }
  0x8b   :  { %5406 = vmatpush.bf16.msrb.mxu0 %v8919_v16  ;;  %v8987_v16 = vld [vmem:[#allocation4 + $0x528] sm:$0xff] }
  0x8c   :  { %5419 = vmatpush.bf16.msrb.mxu1 %v8927_v17  ;;  %v8995_v17 = vld [vmem:[#allocation4 + $0x568] sm:$0xff] }
  0x8d   :  { %5432 = vmatpush.bf16.msrb.mxu2 %v8935_v18  ;;  %v9003_v18 = vld [vmem:[#allocation4 + $0x5a8] sm:$0xff] }
  0x8e   :  { %5445 = vmatpush.bf16.msrb.mxu3 %v8943_v19  ;;  %v9453_v19 = vld [vmem:[#allocation6] ss:$0 sm:$0xff] }
  0x8f   :  { %5407 = vmatpush.bf16.msrb.mxu0 %v8918_v20  ;;  %v9011_v20 = vld [vmem:[#allocation4 + $0x5e8] sm:$0xff] }
  0x90   :  { %5420 = vmatpush.bf16.msrb.mxu1 %v8926_v21  ;;  %v8986_v21 = vld [vmem:[#allocation4 + $0x520] sm:$0xff] }
  0x91   :  { %5433 = vmatpush.bf16.msrb.mxu2 %v8934_v22 }
  0x92   :  { %5446 = vmatpush.bf16.msrb.mxu3 %v8942_v29  ;;  %5408 = vmatmul.bf16.vlgmr.msrb.gmra.mxu0 %v169_v31  ;;  %v8985_v29 = vld [vmem:[#allocation4 + $0x518] sm:$0xff] }
  0x93   :  { %5452 = vmatpush.bf16.msra.mxu0 %v8957_v23  ;;  %5421 = vmatmul.bf16.vlgmr.msrb.gmra.mxu1 %v170_v34  ;;  %v8994_v23 = vld [vmem:[#allocation4 + $0x560] sm:$0xff]  ;;  %v9001_v31 = vld [vmem:[#allocation4 + $0x598] sm:$0xff]  ;;  %v8984_v34 = vld [vmem:[#allocation4 + $0x510] sm:$0xff] }
  0x94   :  { %5465 = vmatpush.bf16.msra.mxu1 %v8965_v25  ;;  %5434 = vmatmul.bf16.vlgmr.msrb.gmra.mxu2 %v171_v33 }
  0x95   :  { %5478 = vmatpush.bf16.msra.mxu2 %v8973_v28  ;;  %5447 = vmatmul.bf16.vlgmr.msrb.gmra.mxu3 %v172_v35 }
  0x96   :  { %5491 = vmatpush.bf16.msra.mxu3 %v8981_v32  ;;  %v9009_v32 = vld [vmem:[#allocation4 + $0x5d8] sm:$0xff] }
  0x97   :  { %5453 = vmatpush.bf16.msra.mxu0 %v8956_v36 }
  0x98   :  { %5466 = vmatpush.bf16.msra.mxu1 %v8964_v37  ;;  %v8992_v37 = vld [vmem:[#allocation4 + $0x550] sm:$0xff] }
  0x99   :  { %5479 = vmatpush.bf16.msra.mxu2 %v8972_v38  ;;  %v9000_v38 = vld [vmem:[#allocation4 + $0x590] sm:$0xff] }
  0x9a   :  { %5492 = vmatpush.bf16.msra.mxu3 %v8980_v39 }
  0x9b   :  { %5454 = vmatpush.bf16.msra.mxu0 %v8955_v40 }
  0x9c   :  { %5467 = vmatpush.bf16.msra.mxu1 %v8963_v41  ;;  %v9008_v41 = vld [vmem:[#allocation4 + $0x5d0] sm:$0xff] }
  0x9d   :  { %5480 = vmatpush.bf16.msra.mxu2 %v8971_v42 }
  0x9e   :  { %5493 = vmatpush.bf16.msra.mxu3 %v8979_v43  ;;  %v8983_v43 = vld [vmem:[#allocation4 + $0x508] sm:$0xff] }
  0x9f   :  { %5455 = vmatpush.bf16.msra.mxu0 %v8954_v44  ;;  %v8991_v44 = vld [vmem:[#allocation4 + $0x548] sm:$0xff] }
  0xa0   :  { %5468 = vmatpush.bf16.msra.mxu1 %v8962_v45  ;;  %v8999_v45 = vld [vmem:[#allocation4 + $0x588] sm:$0xff] }
  0xa1   :  { %5481 = vmatpush.bf16.msra.mxu2 %v8970_v46  ;;  %v9007_v46 = vld [vmem:[#allocation4 + $0x5c8] sm:$0xff] }
  0xa2   :  { %5494 = vmatpush.bf16.msra.mxu3 %v8978_v47 }
  0xa3   :  { %5456 = vmatpush.bf16.msra.mxu0 %v8953_v48  ;;  %v8982_v48 = vld [vmem:[#allocation4 + $0x500] sm:$0xff] }
  0xa4   :  { %5469 = vmatpush.bf16.msra.mxu1 %v8961_v49  ;;  %v8990_v49 = vld [vmem:[#allocation4 + $0x540] sm:$0xff] }
  0xa5   :  { %5482 = vmatpush.bf16.msra.mxu2 %v8969_v50  ;;  %v8998_v50 = vld [vmem:[#allocation4 + $0x580] sm:$0xff] }
  0xa6   :  { %5495 = vmatpush.bf16.msra.mxu3 %v8977_v51  ;;  %v98_v51 = vld [vmem:[#allocation2 + $0xa0] sm:$0xff] }
  0xa7   :  { %5457 = vmatpush.bf16.msra.mxu0 %v8952_v52  ;;  %v100_v52 = vld [vmem:[#allocation2 + $0xb0] sm:$0xff] }
  0xa8   :  { %5470 = vmatpush.bf16.msra.mxu1 %v8960_v53  ;;  %v9021_v53 = vld [vmem:[#allocation4 + $0x638] sm:$0xff] }
  0xa9   :  { %5483 = vmatpush.bf16.msra.mxu2 %v8968_v54  ;;  %v9029_v54 = vld [vmem:[#allocation4 + $0x678] sm:$0xff] }
  0xaa   :  { %5496 = vmatpush.bf16.msra.mxu3 %v8976_v55  ;;  %v99_v55 = vld [vmem:[#allocation2 + $0xa8] sm:$0xff] }
  0xab   :  { %5458 = vmatpush.bf16.msra.mxu0 %v8951_v56  ;;  %v178_v63 = vpack.c.bf16 %v99_v55, %v99_v55  ;;  %v9068_v55 = vld [vmem:[#allocation4 + $0x7b0] sm:$0xff] }
  0xac   :  { %5471 = vmatpush.bf16.msra.mxu1 %v8959_v57  ;;  %v9037_v57 = vld [vmem:[#allocation4 + $0x6b8] sm:$0xff] }
  0xad   :  { %5484 = vmatpush.bf16.msra.mxu2 %v8967_v58  ;;  %v9006_v58 = vld [vmem:[#allocation4 + $0x5c0] sm:$0xff] }
  0xae   :  { %5497 = vmatpush.bf16.msra.mxu3 %v8975_v59  ;;  %v101_v59 = vld [vmem:[#allocation2 + $0xb8] sm:$0xff] }
  0xaf   :  { %5459 = vmatpush.bf16.msra.mxu0 %v8950_v60  ;;  %v5253_v22 = vpop.f32.mrf.mxu0  ;;  %v177_v60 = vpack.c.bf16 %v98_v51, %v98_v51  ;;  %v180_v0 = vpack.c.bf16 %v101_v59, %v101_v59  ;;  %v9067_v59 = vld [vmem:[#allocation4 + $0x7a8] sm:$0xff] }
  0xb0   :  { %5472 = vmatpush.bf16.msra.mxu1 %v8958_v61  ;;  %v5254_v25 = vadd.f32 %v9453_v19, %v5253_v22  ;;  %v5266_v26 = vpop.f32.mrf.mxu1  ;;  %v179_v61 = vpack.c.bf16 %v100_v52, %v100_v52  ;;  %v9033_v19 = vld [vmem:[#allocation4 + $0x698] sm:$0xff] }
  0xb1   :  { %5485 = vmatpush.bf16.msra.mxu2 %v8966_v62  ;;  %v9045_v62 = vld [vmem:[#allocation4 + $0x6f8] sm:$0xff] }
  0xb2   :  { %5498 = vmatpush.bf16.msra.mxu3 %v8974_v5  ;;  %5460 = vmatmul.bf16.vlgmr.msra.gmra.mxu0 %v173_v7  ;;  %v5267_v28 = vadd.f32 %v5266_v26, %v5254_v25  ;;  %v9019_v5 = vld [vmem:[#allocation4 + $0x628] sm:$0xff]  ;;  %v9032_v25 = vld [vmem:[#allocation4 + $0x690] sm:$0xff] }
  0xb3   :  { %5504 = vmatpush.bf16.msrb.mxu0 %v8989_v1  ;;  %5473 = vmatmul.bf16.vlgmr.msra.gmra.mxu1 %v174_v10  ;;  %v9020_v1 = vld [vmem:[#allocation4 + $0x630] sm:$0xff]  ;;  %v9035_v7 = vld [vmem:[#allocation4 + $0x6a8] sm:$0xff]  ;;  %v9026_v10 = vld [vmem:[#allocation4 + $0x660] sm:$0xff] }
  0xb4   :  { %5517 = vmatpush.bf16.msrb.mxu1 %v8997_v2  ;;  %5486 = vmatmul.bf16.vlgmr.msra.gmra.mxu2 %v175_v8  ;;  %v9028_v2 = vld [vmem:[#allocation4 + $0x670] sm:$0xff]  ;;  %v9043_v8 = vld [vmem:[#allocation4 + $0x6e8] sm:$0xff] }
  0xb5   :  { %5530 = vmatpush.bf16.msrb.mxu2 %v9005_v4  ;;  %5499 = vmatmul.bf16.vlgmr.msra.gmra.mxu3 %v176_v11  ;;  %v9044_v4 = vld [vmem:[#allocation4 + $0x6f0] sm:$0xff]  ;;  %v9034_v11 = vld [vmem:[#allocation4 + $0x6a0] sm:$0xff] }
  0xb6   :  { %5543 = vmatpush.bf16.msrb.mxu3 %v9013_v9  ;;  %v9018_v9 = vld [vmem:[#allocation4 + $0x620] sm:$0xff] }
  0xb7   :  { %5505 = vmatpush.bf16.msrb.mxu0 %v8988_v12  ;;  %v5279_v33 = vpop.f32.mrf.mxu2  ;;  %v5255_v36 = vpop.f32.mrf.mxu0 }
  0xb8   :  { %5518 = vmatpush.bf16.msrb.mxu1 %v8996_v13  ;;  %v5280_v35 = vadd.f32 %v5279_v33, %v5267_v28  ;;  %v5292_v39 = vpop.f32.mrf.mxu3  ;;  %v5268_v40 = vpop.f32.mrf.mxu1  ;;  %v9031_v33 = vld [vmem:[#allocation4 + $0x688] sm:$0xff]  ;;  %v9014_v36 = vld [vmem:[#allocation4 + $0x600] sm:$0xff] }
  0xb9   :  { %5531 = vmatpush.bf16.msrb.mxu2 %v9004_v14  ;;  %v104_v40 = vld [vmem:[#allocation2 + $0xd0] sm:$0xff] }
  0xba   :  { %5544 = vmatpush.bf16.msrb.mxu3 %v9012_v15  ;;  %v9605_v42 = vadd.f32 %v5292_v39, %v5280_v35  ;;  %v9042_v15 = vld [vmem:[#allocation4 + $0x6e0] sm:$0xff]  ;;  %v9039_v35 = vld [vmem:[#allocation4 + $0x6c8] sm:$0xff] }
  0xbb   :  { %5506 = vmatpush.bf16.msrb.mxu0 %v8987_v16  ;;  %v9017_v16 = vld [vmem:[#allocation4 + $0x618] sm:$0xff]  ;;  %v102_v39 = vld [vmem:[#allocation2 + $0xc0] sm:$0xff] }
  0xbc   :  { %5519 = vmatpush.bf16.msrb.mxu1 %v8995_v17 }
  0xbd   :  { %5532 = vmatpush.bf16.msrb.mxu2 %v9003_v18  ;;  %v9025_v18 = vld [vmem:[#allocation4 + $0x658] sm:$0xff] }
  0xbe   :  { %5545 = vmatpush.bf16.msrb.mxu3 %v9011_v20 }
  0xbf   :  { %5507 = vmatpush.bf16.msrb.mxu0 %v8986_v21  ;;  %v5281_v47 = vpop.f32.mrf.mxu2  ;;  %v9041_v21 = vld [vmem:[#allocation4 + $0x6d8] sm:$0xff] }
  0xc0   :  { %5520 = vmatpush.bf16.msrb.mxu1 %v8994_v23  ;;  %v5294_v56 = vpop.f32.mrf.mxu3  ;;  %v9016_v23 = vld [vmem:[#allocation4 + $0x610] sm:$0xff]  ;;  %v105_v47 = vld [vmem:[#allocation2 + $0xd8] sm:$0xff] }
  0xc1   :  { %5533 = vmatpush.bf16.msrb.mxu2 %v9002_v24  ;;  %v9024_v24 = vld [vmem:[#allocation4 + $0x650] sm:$0xff]  ;;  %v184_v52 = vpack.c.bf16 %v105_v47, %v105_v47  ;;  %v9099_v47 = vld [vmem:[#allocation4 + $0x8a8] sm:$0xff] }
  0xc2   :  { %5546 = vmatpush.bf16.msrb.mxu3 %v9010_v27  ;;  %v9076_v56 = vld [vmem:[#allocation4 + $0x7f0] sm:$0xff] }
  0xc3   :  { %5508 = vmatpush.bf16.msrb.mxu0 %v8985_v29 }
  0xc4   :  { %5521 = vmatpush.bf16.msrb.mxu1 %v8993_v30  ;;  %v9040_v30 = vld [vmem:[#allocation4 + $0x6d0] sm:$0xff] }
  0xc5   :  { %5534 = vmatpush.bf16.msrb.mxu2 %v9001_v31  ;;  %v9015_v31 = vld [vmem:[#allocation4 + $0x608] sm:$0xff] }
  0xc6   :  { %5547 = vmatpush.bf16.msrb.mxu3 %v9009_v32  ;;  %v9023_v32 = vld [vmem:[#allocation4 + $0x648] sm:$0xff] }
  0xc7   :  { %5509 = vmatpush.bf16.msrb.mxu0 %v8984_v34 }
  0xc8   :  { %5522 = vmatpush.bf16.msrb.mxu1 %v8992_v37  ;;  %v9022_v37 = vld [vmem:[#allocation4 + $0x640] sm:$0xff] }
  0xc9   :  { %5535 = vmatpush.bf16.msrb.mxu2 %v9000_v38  ;;  %v9030_v38 = vld [vmem:[#allocation4 + $0x680] sm:$0xff] }
  0xca   :  { %5548 = vmatpush.bf16.msrb.mxu3 %v9008_v41 }
  0xcb   :  { %5510 = vmatpush.bf16.msrb.mxu0 %v8983_v43  ;;  %v9061_v43 = vld [vmem:[#allocation4 + $0x778] sm:$0xff] }
  0xcc   :  { %5523 = vmatpush.bf16.msrb.mxu1 %v8991_v44  ;;  %v103_v44 = vld [vmem:[#allocation2 + $0xc8] sm:$0xff] }
  0xcd   :  { %5536 = vmatpush.bf16.msrb.mxu2 %v8999_v45  ;;  %v9069_v45 = vld [vmem:[#allocation4 + $0x7b8] sm:$0xff]  ;;  %v182_v51 = vpack.c.bf16 %v103_v44, %v103_v44  ;;  %v9108_v44 = vld [vmem:[#allocation4 + $0x8f0] sm:$0xff] }
  0xce   :  { %5549 = vmatpush.bf16.msrb.mxu3 %v9007_v46  ;;  %v9038_v46 = vld [vmem:[#allocation4 + $0x6c0] sm:$0xff] }
  0xcf   :  { %5511 = vmatpush.bf16.msrb.mxu0 %v8982_v48  ;;  %v5305_v12 = vpop.f32.mrf.mxu0  ;;  %v181_v48 = vpack.c.bf16 %v102_v39, %v102_v39 }
  0xd0   :  { %5524 = vmatpush.bf16.msrb.mxu1 %v8990_v49  ;;  %v5318_v13 = vpop.f32.mrf.mxu1  ;;  %v5306_v14 = vadd.f32 %v5305_v12, %v9605_v42  ;;  %v9053_v42 = vld [vmem:[#allocation4 + $0x738] sm:$0xff]  ;;  %v183_v49 = vpack.c.bf16 %v104_v40, %v104_v40 }
  0xd1   :  { %5537 = vmatpush.bf16.msrb.mxu2 %v8998_v50  ;;  %v9077_v50 = vld [vmem:[#allocation4 + $0x7f8] sm:$0xff] }
  0xd2   :  { %5550 = vmatpush.bf16.msrb.mxu3 %v9006_v58  ;;  %5512 = vmatmul.bf16.vlgmr.msrb.gmra.mxu0 %v177_v60  ;;  %v5319_v17 = vadd.f32 %v5318_v13, %v5306_v14  ;;  %v9059_v58 = vld [vmem:[#allocation4 + $0x768] sm:$0xff]  ;;  %v9048_v13 = vld [vmem:[#allocation4 + $0x710] sm:$0xff] }
  0xd3   :  { %5556 = vmatpush.bf16.msra.mxu0 %v9021_v53  ;;  %5525 = vmatmul.bf16.vlgmr.msrb.gmra.mxu1 %v178_v63  ;;  %v9052_v53 = vld [vmem:[#allocation4 + $0x730] sm:$0xff]  ;;  %v9075_v60 = vld [vmem:[#allocation4 + $0x7e8] sm:$0xff]  ;;  %v9050_v63 = vld [vmem:[#allocation4 + $0x720] sm:$0xff] }
  0xd4   :  { %5569 = vmatpush.bf16.msra.mxu1 %v9029_v54  ;;  %5538 = vmatmul.bf16.vlgmr.msrb.gmra.mxu2 %v179_v61  ;;  %v9060_v54 = vld [vmem:[#allocation4 + $0x770] sm:$0xff] }
  0xd5   :  { %5582 = vmatpush.bf16.msra.mxu2 %v9037_v57  ;;  %5551 = vmatmul.bf16.vlgmr.msrb.gmra.mxu3 %v180_v0  ;;  %v9051_v57 = vld [vmem:[#allocation4 + $0x728] sm:$0xff]  ;;  %v9058_v0 = vld [vmem:[#allocation4 + $0x760] sm:$0xff] }
  0xd6   :  { %5595 = vmatpush.bf16.msra.mxu3 %v9045_v62 }
  0xd7   :  { %5557 = vmatpush.bf16.msra.mxu0 %v9020_v1  ;;  %v5331_v20 = vpop.f32.mrf.mxu2  ;;  %v5307_v27 = vpop.f32.mrf.mxu0  ;;  %v9066_v1 = vld [vmem:[#allocation4 + $0x7a0] sm:$0xff] }
  0xd8   :  { %5570 = vmatpush.bf16.msra.mxu1 %v9028_v2  ;;  %v5332_v22 = vadd.f32 %v5331_v20, %v5319_v17  ;;  %v5344_v26 = vpop.f32.mrf.mxu3  ;;  %v5320_v29 = vpop.f32.mrf.mxu1  ;;  %v9055_v20 = vld [vmem:[#allocation4 + $0x748] sm:$0xff]  ;;  %v9062_v27 = vld [vmem:[#allocation4 + $0x780] sm:$0xff] }
  0xd9   :  { %5583 = vmatpush.bf16.msra.mxu2 %v9036_v3  ;;  %v108_v29 = vld [vmem:[#allocation2 + $0xf0] sm:$0xff] }
  0xda   :  { %5596 = vmatpush.bf16.msra.mxu3 %v9044_v4  ;;  %v5345_v28 = vadd.f32 %v5344_v26, %v5332_v22  ;;  %v9074_v4 = vld [vmem:[#allocation4 + $0x7e0] sm:$0xff] }
  0xdb   :  { %5558 = vmatpush.bf16.msra.mxu0 %v9019_v5  ;;  %v9049_v5 = vld [vmem:[#allocation4 + $0x718] sm:$0xff] }
  0xdc   :  { %5571 = vmatpush.bf16.msra.mxu1 %v9027_v6  ;;  %v9057_v6 = vld [vmem:[#allocation4 + $0x758] sm:$0xff] }
  0xdd   :  { %5584 = vmatpush.bf16.msra.mxu2 %v9035_v7  ;;  %v9065_v7 = vld [vmem:[#allocation4 + $0x798] sm:$0xff] }
  0xde   :  { %5597 = vmatpush.bf16.msra.mxu3 %v9043_v8 }
  0xdf   :  { %5559 = vmatpush.bf16.msra.mxu0 %v9018_v9  ;;  %v5333_v34 = vpop.f32.mrf.mxu2 }
  0xe0   :  { %5572 = vmatpush.bf16.msra.mxu1 %v9026_v10  ;;  %v5346_v41 = vpop.f32.mrf.mxu3  ;;  %v9073_v10 = vld [vmem:[#allocation4 + $0x7d8] sm:$0xff]  ;;  %v9070_v34 = vld [vmem:[#allocation4 + $0x7c0] sm:$0xff] }
  0xe1   :  { %5585 = vmatpush.bf16.msra.mxu2 %v9034_v11  ;;  %v9084_v41 = vld [vmem:[#allocation4 + $0x830] sm:$0xff] }
  0xe2   :  { %5598 = vmatpush.bf16.msra.mxu3 %v9042_v15  ;;  %v9056_v15 = vld [vmem:[#allocation4 + $0x750] sm:$0xff] }
  0xe3   :  { %5560 = vmatpush.bf16.msra.mxu0 %v9017_v16  ;;  %v9064_v16 = vld [vmem:[#allocation4 + $0x790] sm:$0xff] }
  0xe4   :  { %5573 = vmatpush.bf16.msra.mxu1 %v9025_v18  ;;  %v9072_v18 = vld [vmem:[#allocation4 + $0x7d0] sm:$0xff] }
  0xe5   :  { %5586 = vmatpush.bf16.msra.mxu2 %v9033_v19  ;;  %v9047_v19 = vld [vmem:[#allocation4 + $0x708] sm:$0xff] }
  0xe6   :  { %5599 = vmatpush.bf16.msra.mxu3 %v9041_v21  ;;  %v9063_v21 = vld [vmem:[#allocation4 + $0x788] sm:$0xff] }
  0xe7   :  { %5561 = vmatpush.bf16.msra.mxu0 %v9016_v23  ;;  %v9071_v23 = vld [vmem:[#allocation4 + $0x7c8] sm:$0xff] }
  0xe8   :  { %5574 = vmatpush.bf16.msra.mxu1 %v9024_v24  ;;  %v9046_v24 = vld [vmem:[#allocation4 + $0x700] sm:$0xff] }
  0xe9   :  { %5587 = vmatpush.bf16.msra.mxu2 %v9032_v25  ;;  %v9054_v25 = vld [vmem:[#allocation4 + $0x740] sm:$0xff] }
  0xea   :  { %5600 = vmatpush.bf16.msra.mxu3 %v9040_v30  ;;  %v9085_v30 = vld [vmem:[#allocation4 + $0x838] sm:$0xff] }
  0xeb   :  { %5562 = vmatpush.bf16.msra.mxu0 %v9015_v31  ;;  %v9093_v31 = vld [vmem:[#allocation4 + $0x878] sm:$0xff] }
  0xec   :  { %5575 = vmatpush.bf16.msra.mxu1 %v9023_v32  ;;  %v107_v32 = vld [vmem:[#allocation2 + $0xe8] sm:$0xff] }
  0xed   :  { %5588 = vmatpush.bf16.msra.mxu2 %v9031_v33  ;;  %v9101_v33 = vld [vmem:[#allocation4 + $0x8b8] sm:$0xff]  ;;  %v186_v39 = vpack.c.bf16 %v107_v32, %v107_v32  ;;  %v9140_v32 = vld [vmem:[#allocation4 + $0x9f0] sm:$0xff] }
  0xee   :  { %5601 = vmatpush.bf16.msra.mxu3 %v9039_v35  ;;  %v109_v35 = vld [vmem:[#allocation2 + $0xf8] sm:$0xff] }
  0xef   :  { %5563 = vmatpush.bf16.msra.mxu0 %v9014_v36  ;;  %v5357_v61 = vpop.f32.mrf.mxu0  ;;  %v188_v40 = vpack.c.bf16 %v109_v35, %v109_v35  ;;  %v9131_v35 = vld [vmem:[#allocation4 + $0x9a8] sm:$0xff] }
  0xf0   :  { %5576 = vmatpush.bf16.msra.mxu1 %v9022_v37  ;;  %v5358_v62 = vadd.f32 %v5357_v61, %v5345_v28  ;;  %v5370_v2 = vpop.f32.mrf.mxu1  ;;  %v106_v28 = vld [vmem:[#allocation2 + $0xe0] sm:$0xff]  ;;  %v187_v37 = vpack.c.bf16 %v108_v29, %v108_v29  ;;  %v9116_v29 = vld [vmem:[#allocation4 + $0x930] sm:$0xff] }
  0xf1   :  { %5589 = vmatpush.bf16.msra.mxu2 %v9030_v38  ;;  %v185_v36 = vpack.c.bf16 %v106_v28, %v106_v28  ;;  %v9109_v38 = vld [vmem:[#allocation4 + $0x8f8] sm:$0xff] }
  0xf2   :  { %5602 = vmatpush.bf16.msra.mxu3 %v9038_v46  ;;  %5564 = vmatmul.bf16.vlgmr.msra.gmra.mxu0 %v181_v48  ;;  %v5371_v3 = vadd.f32 %v5370_v2, %v5358_v62  ;;  %v9091_v46 = vld [vmem:[#allocation4 + $0x868] sm:$0xff]  ;;  %v9105_v62 = vld [vmem:[#allocation4 + $0x8d8] sm:$0xff] }
  0xf3   :  { %5608 = vmatpush.bf16.msrb.mxu0 %v9053_v42  ;;  %5577 = vmatmul.bf16.vlgmr.msra.gmra.mxu1 %v182_v51  ;;  %v9092_v42 = vld [vmem:[#allocation4 + $0x870] sm:$0xff]  ;;  %v9107_v48 = vld [vmem:[#allocation4 + $0x8e8] sm:$0xff]  ;;  %v9082_v51 = vld [vmem:[#allocation4 + $0x820] sm:$0xff] }
  0xf4   :  { %5621 = vmatpush.bf16.msrb.mxu1 %v9061_v43  ;;  %5590 = vmatmul.bf16.vlgmr.msra.gmra.mxu2 %v183_v49  ;;  %v9100_v43 = vld [vmem:[#allocation4 + $0x8b0] sm:$0xff] }
  0xf5   :  { %5634 = vmatpush.bf16.msrb.mxu2 %v9069_v45  ;;  %5603 = vmatmul.bf16.vlgmr.msra.gmra.mxu3 %v184_v52  ;;  %v9083_v45 = vld [vmem:[#allocation4 + $0x828] sm:$0xff] }
  0xf6   :  { %5647 = vmatpush.bf16.msrb.mxu3 %v9077_v50 }
  0xf7   :  { %5609 = vmatpush.bf16.msrb.mxu0 %v9052_v53  ;;  %v5383_v8 = vpop.f32.mrf.mxu2  ;;  %v5359_v11 = vpop.f32.mrf.mxu0  ;;  %v9090_v53 = vld [vmem:[#allocation4 + $0x860] sm:$0xff] }
  0xf8   :  { %5622 = vmatpush.bf16.msrb.mxu1 %v9060_v54  ;;  %v5384_v9 = vadd.f32 %v5383_v8, %v5371_v3  ;;  %v5396_v12 = vpop.f32.mrf.mxu3  ;;  %v5372_v17 = vpop.f32.mrf.mxu1  ;;  %v9098_v54 = vld [vmem:[#allocation4 + $0x8a0] sm:$0xff]  ;;  %v9087_v8 = vld [vmem:[#allocation4 + $0x848] sm:$0xff] }
  0xf9   :  { %5635 = vmatpush.bf16.msrb.mxu2 %v9068_v55  ;;  %v9103_v11 = vld [vmem:[#allocation4 + $0x8c8] sm:$0xff]  ;;  %v112_v17 = vld [vmem:[#allocation2 + $0x110] sm:$0xff] }
  0xfa   :  { %5648 = vmatpush.bf16.msrb.mxu3 %v9076_v56  ;;  %v5397_v14 = vadd.f32 %v5396_v12, %v5384_v9  ;;  %v9106_v56 = vld [vmem:[#allocation4 + $0x8e0] sm:$0xff]  ;;  %v9095_v9 = vld [vmem:[#allocation4 + $0x888] sm:$0xff] }
  0xfb   :  { %5610 = vmatpush.bf16.msrb.mxu0 %v9051_v57  ;;  %v9081_v57 = vld [vmem:[#allocation4 + $0x818] sm:$0xff] }
  0xfc   :  { %5623 = vmatpush.bf16.msrb.mxu1 %v9059_v58  ;;  %v9089_v58 = vld [vmem:[#allocation4 + $0x858] sm:$0xff] }
  0xfd   :  { %5636 = vmatpush.bf16.msrb.mxu2 %v9067_v59  ;;  %v9097_v59 = vld [vmem:[#allocation4 + $0x898] sm:$0xff] }
  0xfe   :  { %5649 = vmatpush.bf16.msrb.mxu3 %v9075_v60 }
  0xff   :  { %5611 = vmatpush.bf16.msrb.mxu0 %v9050_v63  ;;  %v5385_v22 = vpop.f32.mrf.mxu2 }
 0x100   :  { %5624 = vmatpush.bf16.msrb.mxu1 %v9058_v0  ;;  %v5398_v26 = vpop.f32.mrf.mxu3  ;;  %v9102_v22 = vld [vmem:[#allocation4 + $0x8c0] sm:$0xff] }
 0x101   :  { %5637 = vmatpush.bf16.msrb.mxu2 %v9066_v1  ;;  %v9080_v1 = vld [vmem:[#allocation4 + $0x810] sm:$0xff]  ;;  %v9141_v26 = vld [vmem:[#allocation4 + $0x9f8] sm:$0xff] }
 0x102   :  { %5650 = vmatpush.bf16.msrb.mxu3 %v9074_v4  ;;  %v9088_v4 = vld [vmem:[#allocation4 + $0x850] sm:$0xff] }
 0x103   :  { %5612 = vmatpush.bf16.msrb.mxu0 %v9049_v5  ;;  %v9096_v5 = vld [vmem:[#allocation4 + $0x890] sm:$0xff] }
 0x104   :  { %5625 = vmatpush.bf16.msrb.mxu1 %v9057_v6  ;;  %v9104_v6 = vld [vmem:[#allocation4 + $0x8d0] sm:$0xff] }
 0x105   :  { %5638 = vmatpush.bf16.msrb.mxu2 %v9065_v7  ;;  %v9079_v7 = vld [vmem:[#allocation4 + $0x808] sm:$0xff] }
 0x106   :  { %5651 = vmatpush.bf16.msrb.mxu3 %v9073_v10 }
 0x107   :  { %5613 = vmatpush.bf16.msrb.mxu0 %v9048_v13  ;;  %v9078_v13 = vld [vmem:[#allocation4 + $0x800] sm:$0xff] }
 0x108   :  { %5626 = vmatpush.bf16.msrb.mxu1 %v9056_v15  ;;  %v9094_v15 = vld [vmem:[#allocation4 + $0x880] sm:$0xff] }
 0x109   :  { %5639 = vmatpush.bf16.msrb.mxu2 %v9064_v16  ;;  %v110_v16 = vld [vmem:[#allocation2 + $0x100] sm:$0xff] }
 0x10a   :  { %5652 = vmatpush.bf16.msrb.mxu3 %v9072_v18  ;;  %v9117_v18 = vld [vmem:[#allocation4 + $0x938] sm:$0xff] }
 0x10b   :  { %5614 = vmatpush.bf16.msrb.mxu0 %v9047_v19  ;;  %v9125_v19 = vld [vmem:[#allocation4 + $0x978] sm:$0xff] }
 0x10c   :  { %5627 = vmatpush.bf16.msrb.mxu1 %v9055_v20  ;;  %v111_v20 = vld [vmem:[#allocation2 + $0x108] sm:$0xff] }
 0x10d   :  { %5640 = vmatpush.bf16.msrb.mxu2 %v9063_v21  ;;  %v9133_v21 = vld [vmem:[#allocation4 + $0x9b8] sm:$0xff] }
 0x10e   :  { %5653 = vmatpush.bf16.msrb.mxu3 %v9071_v23  ;;  %v113_v23 = vld [vmem:[#allocation2 + $0x118] sm:$0xff] }
 0x10f   :  { %5615 = vmatpush.bf16.msrb.mxu0 %v9046_v24  ;;  %v5409_v49 = vpop.f32.mrf.mxu0  ;;  %v189_v24 = vpack.c.bf16 %v110_v16, %v110_v16  ;;  %v192_v28 = vpack.c.bf16 %v113_v23, %v113_v23  ;;  %v9163_v23 = vld [vmem:[#allocation4 + $0xaa8] sm:$0xff] }
 0x110   :  { %5628 = vmatpush.bf16.msrb.mxu1 %v9054_v25  ;;  %v5410_v50 = vadd.f32 %v5409_v49, %v5397_v14  ;;  %v5422_v52 = vpop.f32.mrf.mxu1  ;;  %v9086_v14 = vld [vmem:[#allocation4 + $0x840] sm:$0xff]  ;;  %v191_v25 = vpack.c.bf16 %v112_v17, %v112_v17  ;;  %v9148_v17 = vld [vmem:[#allocation4 + $0xa30] sm:$0xff] }
 0x111   :  { %5641 = vmatpush.bf16.msrb.mxu2 %v9062_v27  ;;  %v190_v27 = vpack.c.bf16 %v111_v20, %v111_v20  ;;  %v9172_v20 = vld [vmem:[#allocation4 + $0xaf0] sm:$0xff] }
 0x112   :  { %5654 = vmatpush.bf16.msrb.mxu3 %v9070_v34  ;;  %5616 = vmatmul.bf16.vlgmr.msrb.gmra.mxu0 %v185_v36  ;;  %v5423_v55 = vadd.f32 %v5422_v52, %v5410_v50  ;;  %v9123_v34 = vld [vmem:[#allocation4 + $0x968] sm:$0xff]  ;;  %v9137_v50 = vld [vmem:[#allocation4 + $0x9d8] sm:$0xff] }
 0x113   :  { %5660 = vmatpush.bf16.msra.mxu0 %v9085_v30  ;;  %5629 = vmatmul.bf16.vlgmr.msrb.gmra.mxu1 %v186_v39  ;;  %v9124_v30 = vld [vmem:[#allocation4 + $0x970] sm:$0xff]  ;;  %v9139_v36 = vld [vmem:[#allocation4 + $0x9e8] sm:$0xff]  ;;  %v9114_v39 = vld [vmem:[#allocation4 + $0x920] sm:$0xff] }
 0x114   :  { %5673 = vmatpush.bf16.msra.mxu1 %v9093_v31  ;;  %5642 = vmatmul.bf16.vlgmr.msrb.gmra.mxu2 %v187_v37  ;;  %v9132_v31 = vld [vmem:[#allocation4 + $0x9b0] sm:$0xff] }
 0x115   :  { %5686 = vmatpush.bf16.msra.mxu2 %v9101_v33  ;;  %5655 = vmatmul.bf16.vlgmr.msrb.gmra.mxu3 %v188_v40  ;;  %v9115_v33 = vld [vmem:[#allocation4 + $0x928] sm:$0xff] }
 0x116   :  { %5699 = vmatpush.bf16.msra.mxu3 %v9109_v38 }
 0x117   :  { %5661 = vmatpush.bf16.msra.mxu0 %v9084_v41  ;;  %v5435_v60 = vpop.f32.mrf.mxu2  ;;  %v5411_v0 = vpop.f32.mrf.mxu0  ;;  %v9122_v41 = vld [vmem:[#allocation4 + $0x960] sm:$0xff] }
 0x118   :  { %5674 = vmatpush.bf16.msra.mxu1 %v9092_v42  ;;  %v5436_v61 = vadd.f32 %v5435_v60, %v5423_v55  ;;  %v5448_v63 = vpop.f32.mrf.mxu3  ;;  %v5424_v2 = vpop.f32.mrf.mxu1  ;;  %v9130_v42 = vld [vmem:[#allocation4 + $0x9a0] sm:$0xff]  ;;  %v9119_v60 = vld [vmem:[#allocation4 + $0x948] sm:$0xff] }
 0x119   :  { %5687 = vmatpush.bf16.msra.mxu2 %v9100_v43  ;;  %v9118_v2 = vld [vmem:[#allocation4 + $0x940] sm:$0xff] }
 0x11a   :  { %5700 = vmatpush.bf16.msra.mxu3 %v9108_v44  ;;  %v5449_v3 = vadd.f32 %v5448_v63, %v5436_v61  ;;  %v9138_v44 = vld [vmem:[#allocation4 + $0x9e0] sm:$0xff]  ;;  %v9127_v61 = vld [vmem:[#allocation4 + $0x988] sm:$0xff] }
 0x11b   :  { %5662 = vmatpush.bf16.msra.mxu0 %v9083_v45  ;;  %v9113_v45 = vld [vmem:[#allocation4 + $0x918] sm:$0xff]  ;;  %v9135_v63 = vld [vmem:[#allocation4 + $0x9c8] sm:$0xff] }
 0x11c   :  { %5675 = vmatpush.bf16.msra.mxu1 %v9091_v46  ;;  %v9121_v46 = vld [vmem:[#allocation4 + $0x958] sm:$0xff] }
 0x11d   :  { %5688 = vmatpush.bf16.msra.mxu2 %v9099_v47  ;;  %v9129_v47 = vld [vmem:[#allocation4 + $0x998] sm:$0xff] }
 0x11e   :  { %5701 = vmatpush.bf16.msra.mxu3 %v9107_v48 }
 0x11f   :  { %5663 = vmatpush.bf16.msra.mxu0 %v9082_v51  ;;  %v5437_v10 = vpop.f32.mrf.mxu2 }
 0x120   :  { %5676 = vmatpush.bf16.msra.mxu1 %v9090_v53  ;;  %v5450_v12 = vpop.f32.mrf.mxu3  ;;  %v9134_v10 = vld [vmem:[#allocation4 + $0x9c0] sm:$0xff] }
 0x121   :  { %5689 = vmatpush.bf16.msra.mxu2 %v9098_v54  ;;  %v9112_v54 = vld [vmem:[#allocation4 + $0x910] sm:$0xff] }
 0x122   :  { %5702 = vmatpush.bf16.msra.mxu3 %v9106_v56  ;;  %v9120_v56 = vld [vmem:[#allocation4 + $0x950] sm:$0xff] }
 0x123   :  { %5664 = vmatpush.bf16.msra.mxu0 %v9081_v57  ;;  %v9128_v57 = vld [vmem:[#allocation4 + $0x990] sm:$0xff] }
 0x124   :  { %5677 = vmatpush.bf16.msra.mxu1 %v9089_v58  ;;  %v9136_v58 = vld [vmem:[#allocation4 + $0x9d0] sm:$0xff] }
 0x125   :  { %5690 = vmatpush.bf16.msra.mxu2 %v9097_v59  ;;  %v9111_v59 = vld [vmem:[#allocation4 + $0x908] sm:$0xff] }
 0x126   :  { %5703 = vmatpush.bf16.msra.mxu3 %v9105_v62 }
 0x127   :  { %5665 = vmatpush.bf16.msra.mxu0 %v9080_v1  ;;  %v9110_v1 = vld [vmem:[#allocation4 + $0x900] sm:$0xff] }
 0x128   :  { %5678 = vmatpush.bf16.msra.mxu1 %v9088_v4  ;;  %v114_v4 = vld [vmem:[#allocation2 + $0x120] sm:$0xff] }
 0x129   :  { %5691 = vmatpush.bf16.msra.mxu2 %v9096_v5  ;;  %v116_v5 = vld [vmem:[#allocation2 + $0x130] sm:$0xff]  ;;  %v193_v12 = vpack.c.bf16 %v114_v4, %v114_v4 }
 0x12a   :  { %5704 = vmatpush.bf16.msra.mxu3 %v9104_v6  ;;  %v9149_v6 = vld [vmem:[#allocation4 + $0xa38] sm:$0xff] }
 0x12b   :  { %5666 = vmatpush.bf16.msra.mxu0 %v9079_v7  ;;  %v9157_v7 = vld [vmem:[#allocation4 + $0xa78] sm:$0xff] }
 0x12c   :  { %5679 = vmatpush.bf16.msra.mxu1 %v9087_v8  ;;  %v115_v8 = vld [vmem:[#allocation2 + $0x128] sm:$0xff] }
 0x12d   :  { %5692 = vmatpush.bf16.msra.mxu2 %v9095_v9  ;;  %v9165_v9 = vld [vmem:[#allocation4 + $0xab8] sm:$0xff] }
 0x12e   :  { %5705 = vmatpush.bf16.msra.mxu3 %v9103_v11  ;;  %v117_v11 = vld [vmem:[#allocation2 + $0x138] sm:$0xff] }
 0x12f   :  { %5667 = vmatpush.bf16.msra.mxu0 %v9078_v13  ;;  %v5461_v37 = vpop.f32.mrf.mxu0  ;;  %v195_v13 = vpack.c.bf16 %v116_v5, %v116_v5  ;;  %v196_v16 = vpack.c.bf16 %v117_v11, %v117_v11  ;;  %v9180_v5 = vld [vmem:[#allocation4 + $0xb30] sm:$0xff]  ;;  %v9195_v11 = vld [vmem:[#allocation4 + $0xba8] sm:$0xff] }
 0x130   :  { %5680 = vmatpush.bf16.msra.mxu1 %v9086_v14  ;;  %v5462_v38 = vadd.f32 %v5461_v37, %v5449_v3  ;;  %v5474_v40 = vpop.f32.mrf.mxu1  ;;  %v9126_v3 = vld [vmem:[#allocation4 + $0x980] sm:$0xff]  ;;  %v9173_v14 = vld [vmem:[#allocation4 + $0xaf8] sm:$0xff] }
 0x131   :  { %5693 = vmatpush.bf16.msra.mxu2 %v9094_v15  ;;  %v194_v15 = vpack.c.bf16 %v115_v8, %v115_v8  ;;  %v9204_v8 = vld [vmem:[#allocation4 + $0xbf0] sm:$0xff] }
 0x132   :  { %5706 = vmatpush.bf16.msra.mxu3 %v9102_v22  ;;  %5668 = vmatmul.bf16.vlgmr.msra.gmra.mxu0 %v189_v24  ;;  %v5475_v43 = vadd.f32 %v5474_v40, %v5462_v38  ;;  %v9155_v22 = vld [vmem:[#allocation4 + $0xa68] sm:$0xff]  ;;  %v9169_v38 = vld [vmem:[#allocation4 + $0xad8] sm:$0xff] }
 0x133   :  { %5712 = vmatpush.bf16.msrb.mxu0 %v9117_v18  ;;  %5681 = vmatmul.bf16.vlgmr.msra.gmra.mxu1 %v190_v27  ;;  %v9156_v18 = vld [vmem:[#allocation4 + $0xa70] sm:$0xff]  ;;  %v9171_v24 = vld [vmem:[#allocation4 + $0xae8] sm:$0xff]  ;;  %v9146_v27 = vld [vmem:[#allocation4 + $0xa20] sm:$0xff] }
 0x134   :  { %5725 = vmatpush.bf16.msrb.mxu1 %v9125_v19  ;;  %5694 = vmatmul.bf16.vlgmr.msra.gmra.mxu2 %v191_v25  ;;  %v9164_v19 = vld [vmem:[#allocation4 + $0xab0] sm:$0xff] }
 0x135   :  { %5738 = vmatpush.bf16.msrb.mxu2 %v9133_v21  ;;  %5707 = vmatmul.bf16.vlgmr.msra.gmra.mxu3 %v192_v28  ;;  %v9147_v21 = vld [vmem:[#allocation4 + $0xa28] sm:$0xff] }
 0x136   :  { %5751 = vmatpush.bf16.msrb.mxu3 %v9141_v26 }
 0x137   :  { %5713 = vmatpush.bf16.msrb.mxu0 %v9116_v29  ;;  %v5487_v48 = vpop.f32.mrf.mxu2  ;;  %v5463_v52 = vpop.f32.mrf.mxu0  ;;  %v9154_v29 = vld [vmem:[#allocation4 + $0xa60] sm:$0xff] }
 0x138   :  { %5726 = vmatpush.bf16.msrb.mxu1 %v9124_v30  ;;  %v5488_v49 = vadd.f32 %v5487_v48, %v5475_v43  ;;  %v5500_v51 = vpop.f32.mrf.mxu3  ;;  %v5476_v55 = vpop.f32.mrf.mxu1  ;;  %v9162_v30 = vld [vmem:[#allocation4 + $0xaa0] sm:$0xff]  ;;  %v9151_v48 = vld [vmem:[#allocation4 + $0xa48] sm:$0xff] }
 0x139   :  { %5739 = vmatpush.bf16.msrb.mxu2 %v9132_v31  ;;  %v9158_v55 = vld [vmem:[#allocation4 + $0xa80] sm:$0xff] }
 0x13a   :  { %5752 = vmatpush.bf16.msrb.mxu3 %v9140_v32  ;;  %v9608_v53 = vadd.f32 %v5500_v51, %v5488_v49  ;;  %v9170_v32 = vld [vmem:[#allocation4 + $0xae0] sm:$0xff]  ;;  %v9159_v49 = vld [vmem:[#allocation4 + $0xa88] sm:$0xff] }
 0x13b   :  { %5714 = vmatpush.bf16.msrb.mxu0 %v9115_v33  ;;  %v9145_v33 = vld [vmem:[#allocation4 + $0xa18] sm:$0xff]  ;;  %v9167_v51 = vld [vmem:[#allocation4 + $0xac8] sm:$0xff] }
 0x13c   :  { %5727 = vmatpush.bf16.msrb.mxu1 %v9123_v34  ;;  %v9153_v34 = vld [vmem:[#allocation4 + $0xa58] sm:$0xff] }
 0x13d   :  { %5740 = vmatpush.bf16.msrb.mxu2 %v9131_v35  ;;  %v9161_v35 = vld [vmem:[#allocation4 + $0xa98] sm:$0xff] }
 0x13e   :  { %5753 = vmatpush.bf16.msrb.mxu3 %v9139_v36 }
 0x13f   :  { %5715 = vmatpush.bf16.msrb.mxu0 %v9114_v39  ;;  %v5489_v62 = vpop.f32.mrf.mxu2 }
 0x140   :  { %5728 = vmatpush.bf16.msrb.mxu1 %v9122_v41  ;;  %v5502_v0 = vpop.f32.mrf.mxu3  ;;  %v9166_v62 = vld [vmem:[#allocation4 + $0xac0] sm:$0xff] }
 0x141   :  { %5741 = vmatpush.bf16.msrb.mxu2 %v9130_v42  ;;  %v9144_v42 = vld [vmem:[#allocation4 + $0xa10] sm:$0xff] }
 0x142   :  { %5754 = vmatpush.bf16.msrb.mxu3 %v9138_v44  ;;  %v9152_v44 = vld [vmem:[#allocation4 + $0xa50] sm:$0xff] }
 0x143   :  { %5716 = vmatpush.bf16.msrb.mxu0 %v9113_v45  ;;  %v9160_v45 = vld [vmem:[#allocation4 + $0xa90] sm:$0xff] }
 0x144   :  { %5729 = vmatpush.bf16.msrb.mxu1 %v9121_v46  ;;  %v9168_v46 = vld [vmem:[#allocation4 + $0xad0] sm:$0xff] }
 0x145   :  { %5742 = vmatpush.bf16.msrb.mxu2 %v9129_v47  ;;  %v9143_v47 = vld [vmem:[#allocation4 + $0xa08] sm:$0xff] }
 0x146   :  { %5755 = vmatpush.bf16.msrb.mxu3 %v9137_v50 }
 0x147   :  { %5717 = vmatpush.bf16.msrb.mxu0 %v9112_v54  ;;  %v9150_v54 = vld [vmem:[#allocation4 + $0xa40] sm:$0xff] }
 0x148   :  { %5730 = vmatpush.bf16.msrb.mxu1 %v9120_v56  ;;  %v118_v56 = vld [vmem:[#allocation2 + $0x140] sm:$0xff] }
 0x149   :  { %5743 = vmatpush.bf16.msrb.mxu2 %v9128_v57  ;;  %v120_v57 = vld [vmem:[#allocation2 + $0x150] sm:$0xff]  ;;  %v197_v0 = vpack.c.bf16 %v118_v56, %v118_v56 }
 0x14a   :  { %5756 = vmatpush.bf16.msrb.mxu3 %v9136_v58  ;;  %v9181_v58 = vld [vmem:[#allocation4 + $0xb38] sm:$0xff] }
 0x14b   :  { %5718 = vmatpush.bf16.msrb.mxu0 %v9111_v59  ;;  %v9189_v59 = vld [vmem:[#allocation4 + $0xb78] sm:$0xff] }
 0x14c   :  { %5731 = vmatpush.bf16.msrb.mxu1 %v9119_v60  ;;  %v119_v60 = vld [vmem:[#allocation2 + $0x148] sm:$0xff] }
 0x14d   :  { %5744 = vmatpush.bf16.msrb.mxu2 %v9127_v61  ;;  %v9197_v61 = vld [vmem:[#allocation4 + $0xbb8] sm:$0xff] }
 0x14e   :  { %5757 = vmatpush.bf16.msrb.mxu3 %v9135_v63  ;;  %v121_v63 = vld [vmem:[#allocation2 + $0x158] sm:$0xff] }
 0x14f   :  { %5719 = vmatpush.bf16.msrb.mxu0 %v9110_v1  ;;  %v5513_v25 = vpop.f32.mrf.mxu0  ;;  %v199_v1 = vpack.c.bf16 %v120_v57, %v120_v57  ;;  %v200_v4 = vpack.c.bf16 %v121_v63, %v121_v63  ;;  %v9212_v57 = vld [vmem:[#allocation4 + $0xc30] sm:$0xff]  ;;  %v9227_v63 = vld [vmem:[#allocation4 + $0xca8] sm:$0xff] }
 0x150   :  { %5732 = vmatpush.bf16.msrb.mxu1 %v9118_v2  ;;  %v5514_v26 = vadd.f32 %v5513_v25, %v9608_v53  ;;  %v5526_v28 = vpop.f32.mrf.mxu1  ;;  %v9142_v53 = vld [vmem:[#allocation4 + $0xa00] sm:$0xff]  ;;  %v9205_v2 = vld [vmem:[#allocation4 + $0xbf8] sm:$0xff] }
 0x151   :  { %5745 = vmatpush.bf16.msrb.mxu2 %v9126_v3  ;;  %v198_v3 = vpack.c.bf16 %v119_v60, %v119_v60  ;;  %v9236_v60 = vld [vmem:[#allocation4 + $0xcf0] sm:$0xff] }
 0x152   :  { %5758 = vmatpush.bf16.msrb.mxu3 %v9134_v10  ;;  %5720 = vmatmul.bf16.vlgmr.msrb.gmra.mxu0 %v193_v12  ;;  %v5527_v31 = vadd.f32 %v5526_v28, %v5514_v26  ;;  %v9187_v10 = vld [vmem:[#allocation4 + $0xb68] sm:$0xff]  ;;  %v9201_v26 = vld [vmem:[#allocation4 + $0xbd8] sm:$0xff] }
 0x153   :  { %5764 = vmatpush.bf16.msra.mxu0 %v9149_v6  ;;  %5733 = vmatmul.bf16.vlgmr.msrb.gmra.mxu1 %v194_v15  ;;  %v9188_v6 = vld [vmem:[#allocation4 + $0xb70] sm:$0xff]  ;;  %v9203_v12 = vld [vmem:[#allocation4 + $0xbe8] sm:$0xff]  ;;  %v9178_v15 = vld [vmem:[#allocation4 + $0xb20] sm:$0xff] }
 0x154   :  { %5777 = vmatpush.bf16.msra.mxu1 %v9157_v7  ;;  %5746 = vmatmul.bf16.vlgmr.msrb.gmra.mxu2 %v195_v13  ;;  %v9196_v7 = vld [vmem:[#allocation4 + $0xbb0] sm:$0xff] }
 0x155   :  { %5790 = vmatpush.bf16.msra.mxu2 %v9165_v9  ;;  %5759 = vmatmul.bf16.vlgmr.msrb.gmra.mxu3 %v196_v16  ;;  %v9179_v9 = vld [vmem:[#allocation4 + $0xb28] sm:$0xff] }
 0x156   :  { %5803 = vmatpush.bf16.msra.mxu3 %v9173_v14 }
 0x157   :  { %5765 = vmatpush.bf16.msra.mxu0 %v9148_v17  ;;  %v5539_v36 = vpop.f32.mrf.mxu2  ;;  %v5515_v40 = vpop.f32.mrf.mxu0  ;;  %v9186_v17 = vld [vmem:[#allocation4 + $0xb60] sm:$0xff] }
 0x158   :  { %5778 = vmatpush.bf16.msra.mxu1 %v9156_v18  ;;  %v5540_v37 = vadd.f32 %v5539_v36, %v5527_v31  ;;  %v5552_v39 = vpop.f32.mrf.mxu3  ;;  %v5528_v43 = vpop.f32.mrf.mxu1  ;;  %v9194_v18 = vld [vmem:[#allocation4 + $0xba0] sm:$0xff]  ;;  %v9183_v36 = vld [vmem:[#allocation4 + $0xb48] sm:$0xff] }
 0x159   :  { %5791 = vmatpush.bf16.msra.mxu2 %v9164_v19  ;;  %v9190_v43 = vld [vmem:[#allocation4 + $0xb80] sm:$0xff] }
 0x15a   :  { %5804 = vmatpush.bf16.msra.mxu3 %v9172_v20  ;;  %v9611_v41 = vadd.f32 %v5552_v39, %v5540_v37  ;;  %v9202_v20 = vld [vmem:[#allocation4 + $0xbe0] sm:$0xff]  ;;  %v9191_v37 = vld [vmem:[#allocation4 + $0xb88] sm:$0xff] }
 0x15b   :  { %5766 = vmatpush.bf16.msra.mxu0 %v9147_v21  ;;  %v9177_v21 = vld [vmem:[#allocation4 + $0xb18] sm:$0xff]  ;;  %v9199_v39 = vld [vmem:[#allocation4 + $0xbc8] sm:$0xff] }
 0x15c   :  { %5779 = vmatpush.bf16.msra.mxu1 %v9155_v22  ;;  %v9185_v22 = vld [vmem:[#allocation4 + $0xb58] sm:$0xff] }
 0x15d   :  { %5792 = vmatpush.bf16.msra.mxu2 %v9163_v23  ;;  %v9193_v23 = vld [vmem:[#allocation4 + $0xb98] sm:$0xff] }
 0x15e   :  { %5805 = vmatpush.bf16.msra.mxu3 %v9171_v24 }
 0x15f   :  { %5767 = vmatpush.bf16.msra.mxu0 %v9146_v27  ;;  %v5541_v50 = vpop.f32.mrf.mxu2 }
 0x160   :  { %5780 = vmatpush.bf16.msra.mxu1 %v9154_v29  ;;  %v5554_v52 = vpop.f32.mrf.mxu3  ;;  %v9198_v50 = vld [vmem:[#allocation4 + $0xbc0] sm:$0xff] }
 0x161   :  { %5793 = vmatpush.bf16.msra.mxu2 %v9162_v30  ;;  %v9176_v30 = vld [vmem:[#allocation4 + $0xb10] sm:$0xff] }
 0x162   :  { %5806 = vmatpush.bf16.msra.mxu3 %v9170_v32  ;;  %v9184_v32 = vld [vmem:[#allocation4 + $0xb50] sm:$0xff] }
 0x163   :  { %5768 = vmatpush.bf16.msra.mxu0 %v9145_v33  ;;  %v9192_v33 = vld [vmem:[#allocation4 + $0xb90] sm:$0xff] }
 0x164   :  { %5781 = vmatpush.bf16.msra.mxu1 %v9153_v34  ;;  %v9200_v34 = vld [vmem:[#allocation4 + $0xbd0] sm:$0xff] }
 0x165   :  { %5794 = vmatpush.bf16.msra.mxu2 %v9161_v35  ;;  %v9175_v35 = vld [vmem:[#allocation4 + $0xb08] sm:$0xff] }
 0x166   :  { %5807 = vmatpush.bf16.msra.mxu3 %v9169_v38 }
 0x167   :  { %5769 = vmatpush.bf16.msra.mxu0 %v9144_v42  ;;  %v9182_v42 = vld [vmem:[#allocation4 + $0xb40] sm:$0xff] }
 0x168   :  { %5782 = vmatpush.bf16.msra.mxu1 %v9152_v44  ;;  %v122_v44 = vld [vmem:[#allocation2 + $0x160] sm:$0xff] }
 0x169   :  { %5795 = vmatpush.bf16.msra.mxu2 %v9160_v45  ;;  %v124_v45 = vld [vmem:[#allocation2 + $0x170] sm:$0xff]  ;;  %v201_v52 = vpack.c.bf16 %v122_v44, %v122_v44  ;;  %v9244_v44 = vld [vmem:[#allocation4 + $0xd30] sm:$0xff] }
 0x16a   :  { %5808 = vmatpush.bf16.msra.mxu3 %v9168_v46  ;;  %v9213_v46 = vld [vmem:[#allocation4 + $0xc38] sm:$0xff] }
 0x16b   :  { %5770 = vmatpush.bf16.msra.mxu0 %v9143_v47  ;;  %v9221_v47 = vld [vmem:[#allocation4 + $0xc78] sm:$0xff] }
 0x16c   :  { %5783 = vmatpush.bf16.msra.mxu1 %v9151_v48  ;;  %v123_v48 = vld [vmem:[#allocation2 + $0x168] sm:$0xff] }
 0x16d   :  { %5796 = vmatpush.bf16.msra.mxu2 %v9159_v49  ;;  %v9229_v49 = vld [vmem:[#allocation4 + $0xcb8] sm:$0xff] }
 0x16e   :  { %5809 = vmatpush.bf16.msra.mxu3 %v9167_v51  ;;  %v125_v51 = vld [vmem:[#allocation2 + $0x178] sm:$0xff] }
 0x16f   :  { %5771 = vmatpush.bf16.msra.mxu0 %v9142_v53  ;;  %v5565_v13 = vpop.f32.mrf.mxu0  ;;  %v203_v53 = vpack.c.bf16 %v124_v45, %v124_v45  ;;  %v204_v56 = vpack.c.bf16 %v125_v51, %v125_v51  ;;  %v9252_v45 = vld [vmem:[#allocation4 + $0xd70] sm:$0xff] }
 0x170   :  { %5784 = vmatpush.bf16.msra.mxu1 %v9150_v54  ;;  %v5566_v14 = vadd.f32 %v5565_v13, %v9611_v41  ;;  %v5578_v16 = vpop.f32.mrf.mxu1  ;;  %v9174_v41 = vld [vmem:[#allocation4 + $0xb00] sm:$0xff]  ;;  %v9237_v54 = vld [vmem:[#allocation4 + $0xcf8] sm:$0xff] }
 0x171   :  { %5797 = vmatpush.bf16.msra.mxu2 %v9158_v55  ;;  %v202_v55 = vpack.c.bf16 %v123_v48, %v123_v48  ;;  %v9243_v48 = vld [vmem:[#allocation4 + $0xd28] sm:$0xff] }
 0x172   :  { %5810 = vmatpush.bf16.msra.mxu3 %v9166_v62  ;;  %5772 = vmatmul.bf16.vlgmr.msra.gmra.mxu0 %v197_v0  ;;  %v5579_v19 = vadd.f32 %v5578_v16, %v5566_v14  ;;  %v9219_v62 = vld [vmem:[#allocation4 + $0xc68] sm:$0xff]  ;;  %v9233_v14 = vld [vmem:[#allocation4 + $0xcd8] sm:$0xff] }
 0x173   :  { %5816 = vmatpush.bf16.msrb.mxu0 %v9181_v58  ;;  %5785 = vmatmul.bf16.vlgmr.msra.gmra.mxu1 %v198_v3  ;;  %v9220_v58 = vld [vmem:[#allocation4 + $0xc70] sm:$0xff]  ;;  %v9235_v0 = vld [vmem:[#allocation4 + $0xce8] sm:$0xff]  ;;  %v9210_v3 = vld [vmem:[#allocation4 + $0xc20] sm:$0xff] }
 0x174   :  { %5829 = vmatpush.bf16.msrb.mxu1 %v9189_v59  ;;  %5798 = vmatmul.bf16.vlgmr.msra.gmra.mxu2 %v199_v1  ;;  %v9228_v59 = vld [vmem:[#allocation4 + $0xcb0] sm:$0xff] }
 0x175   :  { %5842 = vmatpush.bf16.msrb.mxu2 %v9197_v61  ;;  %5811 = vmatmul.bf16.vlgmr.msra.gmra.mxu3 %v200_v4  ;;  %v9211_v61 = vld [vmem:[#allocation4 + $0xc28] sm:$0xff] }
 0x176   :  { %5855 = vmatpush.bf16.msrb.mxu3 %v9205_v2 }
 0x177   :  { %5817 = vmatpush.bf16.msrb.mxu0 %v9180_v5  ;;  %v5591_v24 = vpop.f32.mrf.mxu2  ;;  %v5567_v28 = vpop.f32.mrf.mxu0  ;;  %v9218_v5 = vld [vmem:[#allocation4 + $0xc60] sm:$0xff] }
 0x178   :  { %5830 = vmatpush.bf16.msrb.mxu1 %v9188_v6  ;;  %v5592_v25 = vadd.f32 %v5591_v24, %v5579_v19  ;;  %v5604_v27 = vpop.f32.mrf.mxu3  ;;  %v5580_v31 = vpop.f32.mrf.mxu1  ;;  %v9226_v6 = vld [vmem:[#allocation4 + $0xca0] sm:$0xff]  ;;  %v9216_v19 = vld [vmem:[#allocation4 + $0xc50] sm:$0xff]  ;;  %v9223_v24 = vld [vmem:[#allocation4 + $0xc88] sm:$0xff] }
 0x179   :  { %5843 = vmatpush.bf16.msrb.mxu2 %v9196_v7  ;;  %v9206_v28 = vld [vmem:[#allocation4 + $0xc00] sm:$0xff]  ;;  %v126_v31 = vld [vmem:[#allocation2 + $0x180] sm:$0xff] }
 0x17a   :  { %5856 = vmatpush.bf16.msrb.mxu3 %v9204_v8  ;;  %v9614_v29 = vadd.f32 %v5604_v27, %v5592_v25  ;;  %v9234_v8 = vld [vmem:[#allocation4 + $0xce0] sm:$0xff] }
 0x17b   :  { %5818 = vmatpush.bf16.msrb.mxu0 %v9179_v9  ;;  %v9209_v9 = vld [vmem:[#allocation4 + $0xc18] sm:$0xff] }
 0x17c   :  { %5831 = vmatpush.bf16.msrb.mxu1 %v9187_v10  ;;  %v9217_v10 = vld [vmem:[#allocation4 + $0xc58] sm:$0xff] }
 0x17d   :  { %5844 = vmatpush.bf16.msrb.mxu2 %v9195_v11  ;;  %v9225_v11 = vld [vmem:[#allocation4 + $0xc98] sm:$0xff] }
 0x17e   :  { %5857 = vmatpush.bf16.msrb.mxu3 %v9203_v12 }
 0x17f   :  { %5819 = vmatpush.bf16.msrb.mxu0 %v9178_v15  ;;  %v5593_v38 = vpop.f32.mrf.mxu2 }
 0x180   :  { %5832 = vmatpush.bf16.msrb.mxu1 %v9186_v17  ;;  %v5606_v40 = vpop.f32.mrf.mxu3  ;;  %v9208_v17 = vld [vmem:[#allocation4 + $0xc10] sm:$0xff]  ;;  %v129_v38 = vld [vmem:[#allocation2 + $0x198] sm:$0xff] }
 0x181   :  { %5845 = vmatpush.bf16.msrb.mxu2 %v9194_v18 }
 0x182   :  { %5858 = vmatpush.bf16.msrb.mxu3 %v9202_v20  ;;  %v9224_v20 = vld [vmem:[#allocation4 + $0xc90] sm:$0xff] }
 0x183   :  { %5820 = vmatpush.bf16.msrb.mxu0 %v9177_v21  ;;  %v9232_v21 = vld [vmem:[#allocation4 + $0xcd0] sm:$0xff] }
 0x184   :  { %5833 = vmatpush.bf16.msrb.mxu1 %v9185_v22  ;;  %v9207_v22 = vld [vmem:[#allocation4 + $0xc08] sm:$0xff] }
 0x185   :  { %5846 = vmatpush.bf16.msrb.mxu2 %v9193_v23  ;;  %v9215_v23 = vld [vmem:[#allocation4 + $0xc48] sm:$0xff] }
 0x186   :  { %5859 = vmatpush.bf16.msrb.mxu3 %v9201_v26  ;;  %v9231_v26 = vld [vmem:[#allocation4 + $0xcc8] sm:$0xff] }
 0x187   :  { %5821 = vmatpush.bf16.msrb.mxu0 %v9176_v30  ;;  %v9222_v30 = vld [vmem:[#allocation4 + $0xc80] sm:$0xff] }
 0x188   :  { %5834 = vmatpush.bf16.msrb.mxu1 %v9184_v32  ;;  %v128_v32 = vld [vmem:[#allocation2 + $0x190] sm:$0xff] }
 0x189   :  { %5847 = vmatpush.bf16.msrb.mxu2 %v9192_v33  ;;  %v9245_v33 = vld [vmem:[#allocation4 + $0xd38] sm:$0xff]  ;;  %v207_v40 = vpack.c.bf16 %v128_v32, %v128_v32 }
 0x18a   :  { %5860 = vmatpush.bf16.msrb.mxu3 %v9200_v34  ;;  %v9253_v34 = vld [vmem:[#allocation4 + $0xd78] sm:$0xff] }
 0x18b   :  { %5822 = vmatpush.bf16.msrb.mxu0 %v9175_v35  ;;  %v127_v35 = vld [vmem:[#allocation2 + $0x188] sm:$0xff] }
 0x18c   :  { %5835 = vmatpush.bf16.msrb.mxu1 %v9183_v36  ;;  %v9261_v36 = vld [vmem:[#allocation4 + $0xdb8] sm:$0xff] }
 0x18d   :  { %5848 = vmatpush.bf16.msrb.mxu2 %v9191_v37  ;;  %v9230_v37 = vld [vmem:[#allocation4 + $0xcc0] sm:$0xff] }
 0x18e   :  { %5861 = vmatpush.bf16.msrb.mxu3 %v9199_v39  ;;  %v205_v39 = vpack.c.bf16 %v126_v31, %v126_v31 }
 0x18f   :  { %5823 = vmatpush.bf16.msrb.mxu0 %v9174_v41  ;;  %v5617_v1 = vpop.f32.mrf.mxu0  ;;  %v9269_v41 = vld [vmem:[#allocation4 + $0xdf8] sm:$0xff] }
 0x190   :  { %5836 = vmatpush.bf16.msrb.mxu1 %v9182_v42  ;;  %v5618_v2 = vadd.f32 %v5617_v1, %v9614_v29  ;;  %v5630_v4 = vpop.f32.mrf.mxu1  ;;  %v9214_v29 = vld [vmem:[#allocation4 + $0xc40] sm:$0xff]  ;;  %v206_v42 = vpack.c.bf16 %v127_v35, %v127_v35  ;;  %v9292_v35 = vld [vmem:[#allocation4 + $0xeb0] sm:$0xff] }
 0x191   :  { %5849 = vmatpush.bf16.msrb.mxu2 %v9190_v43  ;;  %v208_v43 = vpack.c.bf16 %v129_v38, %v129_v38  ;;  %v9283_v38 = vld [vmem:[#allocation4 + $0xe68] sm:$0xff] }
 0x192   :  { %5862 = vmatpush.bf16.msrb.mxu3 %v9198_v50  ;;  %5824 = vmatmul.bf16.vlgmr.msrb.gmra.mxu0 %v201_v52  ;;  %v5631_v7 = vadd.f32 %v5630_v4, %v5618_v2  ;;  %v9259_v50 = vld [vmem:[#allocation4 + $0xda8] sm:$0xff]  ;;  %v9265_v2 = vld [vmem:[#allocation4 + $0xdd8] sm:$0xff] }
 0x193   :  { %5868 = vmatpush.bf16.msra.mxu0 %v9213_v46  ;;  %5837 = vmatmul.bf16.vlgmr.msrb.gmra.mxu1 %v202_v55  ;;  %v9260_v46 = vld [vmem:[#allocation4 + $0xdb0] sm:$0xff]  ;;  %v9267_v52 = vld [vmem:[#allocation4 + $0xde8] sm:$0xff]  ;;  %v9242_v55 = vld [vmem:[#allocation4 + $0xd20] sm:$0xff] }
 0x194   :  { %5881 = vmatpush.bf16.msra.mxu1 %v9221_v47  ;;  %5850 = vmatmul.bf16.vlgmr.msrb.gmra.mxu2 %v203_v53  ;;  %v9268_v47 = vld [vmem:[#allocation4 + $0xdf0] sm:$0xff] }
 0x195   :  { %5894 = vmatpush.bf16.msra.mxu2 %v9229_v49  ;;  %5863 = vmatmul.bf16.vlgmr.msrb.gmra.mxu3 %v204_v56  ;;  %v9251_v49 = vld [vmem:[#allocation4 + $0xd68] sm:$0xff] }
 0x196   :  { %5907 = vmatpush.bf16.msra.mxu3 %v9237_v54 }
 0x197   :  { %5869 = vmatpush.bf16.msra.mxu0 %v9212_v57  ;;  %v5643_v12 = vpop.f32.mrf.mxu2  ;;  %v5619_v16 = vpop.f32.mrf.mxu0  ;;  %v9250_v57 = vld [vmem:[#allocation4 + $0xd60] sm:$0xff] }
 0x198   :  { %5882 = vmatpush.bf16.msra.mxu1 %v9220_v58  ;;  %v9617_v13 = vadd.f32 %v5643_v12, %v5631_v7  ;;  %v9619_v15 = vpop.f32.mrf.mxu3  ;;  %v5632_v18 = vpop.f32.mrf.mxu1  ;;  %v9258_v58 = vld [vmem:[#allocation4 + $0xda0] sm:$0xff]  ;;  %v9247_v12 = vld [vmem:[#allocation4 + $0xd48] sm:$0xff] }
 0x199   :  { %5895 = vmatpush.bf16.msra.mxu2 %v9228_v59  ;;  %v9246_v18 = vld [vmem:[#allocation4 + $0xd40] sm:$0xff] }
 0x19a   :  { %5908 = vmatpush.bf16.msra.mxu3 %v9236_v60  ;;  %v5657_v51 = vadd.f32 %v9619_v15, %v9617_v13  ;;  %v9266_v60 = vld [vmem:[#allocation4 + $0xde0] sm:$0xff]  ;;  %v9255_v13 = vld [vmem:[#allocation4 + $0xd88] sm:$0xff] }
 0x19b   :  { %5870 = vmatpush.bf16.msra.mxu0 %v9211_v61  ;;  %v9241_v61 = vld [vmem:[#allocation4 + $0xd18] sm:$0xff]  ;;  %v9263_v15 = vld [vmem:[#allocation4 + $0xdc8] sm:$0xff] }
 0x19c   :  { %5883 = vmatpush.bf16.msra.mxu1 %v9219_v62  ;;  %v9249_v62 = vld [vmem:[#allocation4 + $0xd58] sm:$0xff] }
 0x19d   :  { %5896 = vmatpush.bf16.msra.mxu2 %v9227_v63  ;;  %v9257_v63 = vld [vmem:[#allocation4 + $0xd98] sm:$0xff] }
 0x19e   :  { %5909 = vmatpush.bf16.msra.mxu3 %v9235_v0 }
 0x19f   :  { %5871 = vmatpush.bf16.msra.mxu0 %v9210_v3  ;;  %v5645_v25 = vpop.f32.mrf.mxu2 }
 0x1a0   :  { %5884 = vmatpush.bf16.msra.mxu1 %v9218_v5  ;;  %v5658_v27 = vpop.f32.mrf.mxu3  ;;  %v9293_v25 = vld [vmem:[#allocation4 + $0xeb8] sm:$0xff] }
 0x1a1   :  { %5897 = vmatpush.bf16.msra.mxu2 %v9226_v6  ;;  %v9240_v6 = vld [vmem:[#allocation4 + $0xd10] sm:$0xff]  ;;  %v133_v27 = vld [vmem:[#allocation2 + $0x1b8] sm:$0xff] }
 0x1a2   :  { %5910 = vmatpush.bf16.msra.mxu3 %v9234_v8  ;;  %v9248_v8 = vld [vmem:[#allocation4 + $0xd50] sm:$0xff]  ;;  %v212_v32 = vpack.c.bf16 %v133_v27, %v133_v27  ;;  %v9323_v27 = vld [vmem:[#allocation4 + $0xfa8] sm:$0xff] }
 0x1a3   :  { %5872 = vmatpush.bf16.msra.mxu0 %v9209_v9  ;;  %v9256_v9 = vld [vmem:[#allocation4 + $0xd90] sm:$0xff] }
 0x1a4   :  { %5885 = vmatpush.bf16.msra.mxu1 %v9217_v10  ;;  %v9264_v10 = vld [vmem:[#allocation4 + $0xdd0] sm:$0xff] }
 0x1a5   :  { %5898 = vmatpush.bf16.msra.mxu2 %v9225_v11  ;;  %v9239_v11 = vld [vmem:[#allocation4 + $0xd08] sm:$0xff] }
 0x1a6   :  { %5911 = vmatpush.bf16.msra.mxu3 %v9233_v14 }
 0x1a7   :  { %5873 = vmatpush.bf16.msra.mxu0 %v9208_v17  ;;  %v9238_v17 = vld [vmem:[#allocation4 + $0xd00] sm:$0xff] }
 0x1a8   :  { %5886 = vmatpush.bf16.msra.mxu1 %v9216_v19  ;;  %v9254_v19 = vld [vmem:[#allocation4 + $0xd80] sm:$0xff] }
 0x1a9   :  { %5899 = vmatpush.bf16.msra.mxu2 %v9224_v20  ;;  %v130_v20 = vld [vmem:[#allocation2 + $0x1a0] sm:$0xff] }
 0x1aa   :  { %5912 = vmatpush.bf16.msra.mxu3 %v9232_v21  ;;  %v132_v21 = vld [vmem:[#allocation2 + $0x1b0] sm:$0xff] }
 0x1ab   :  { %5874 = vmatpush.bf16.msra.mxu0 %v9207_v22  ;;  %v9277_v22 = vld [vmem:[#allocation4 + $0xe38] sm:$0xff] }
 0x1ac   :  { %5887 = vmatpush.bf16.msra.mxu1 %v9215_v23  ;;  %v9285_v23 = vld [vmem:[#allocation4 + $0xe78] sm:$0xff] }
 0x1ad   :  { %5900 = vmatpush.bf16.msra.mxu2 %v9223_v24  ;;  %v131_v24 = vld [vmem:[#allocation2 + $0x1a8] sm:$0xff] }
 0x1ae   :  { %5913 = vmatpush.bf16.msra.mxu3 %v9231_v26  ;;  %v9262_v26 = vld [vmem:[#allocation4 + $0xdc0] sm:$0xff]  ;;  %v210_v31 = vpack.c.bf16 %v131_v24, %v131_v24  ;;  %v9332_v24 = vld [vmem:[#allocation4 + $0xff0] sm:$0xff] }
 0x1af   :  { %5875 = vmatpush.bf16.msra.mxu0 %v9206_v28  ;;  %v5669_v53 = vpop.f32.mrf.mxu0  ;;  %v209_v28 = vpack.c.bf16 %v130_v20, %v130_v20 }
 0x1b0   :  { %5888 = vmatpush.bf16.msra.mxu1 %v9214_v29  ;;  %v5670_v54 = vadd.f32 %v5669_v53, %v5657_v51  ;;  %v5682_v56 = vpop.f32.mrf.mxu1  ;;  %v211_v29 = vpack.c.bf16 %v132_v21, %v132_v21  ;;  %v9289_v51 = vld [vmem:[#allocation4 + $0xe98] sm:$0xff]  ;;  %v9308_v21 = vld [vmem:[#allocation4 + $0xf30] sm:$0xff] }
 0x1b1   :  { %5901 = vmatpush.bf16.msra.mxu2 %v9222_v30  ;;  %v9301_v30 = vld [vmem:[#allocation4 + $0xef8] sm:$0xff] }
 0x1b2   :  { %5914 = vmatpush.bf16.msra.mxu3 %v9230_v37  ;;  %5876 = vmatmul.bf16.vlgmr.msra.gmra.mxu0 %v205_v39  ;;  %v5683_v59 = vadd.f32 %v5682_v56, %v5670_v54  ;;  %v9275_v37 = vld [vmem:[#allocation4 + $0xe28] sm:$0xff]  ;;  %v9297_v54 = vld [vmem:[#allocation4 + $0xed8] sm:$0xff] }
 0x1b3   :  { %5920 = vmatpush.bf16.msrb.mxu0 %v9245_v33  ;;  %5889 = vmatmul.bf16.vlgmr.msra.gmra.mxu1 %v206_v42  ;;  %v9276_v33 = vld [vmem:[#allocation4 + $0xe30] sm:$0xff]  ;;  %v9291_v39 = vld [vmem:[#allocation4 + $0xea8] sm:$0xff] }
 0x1b4   :  { %5933 = vmatpush.bf16.msrb.mxu1 %v9253_v34  ;;  %5902 = vmatmul.bf16.vlgmr.msra.gmra.mxu2 %v207_v40  ;;  %v9284_v34 = vld [vmem:[#allocation4 + $0xe70] sm:$0xff]  ;;  %v9299_v40 = vld [vmem:[#allocation4 + $0xee8] sm:$0xff] }
 0x1b5   :  { %5946 = vmatpush.bf16.msrb.mxu2 %v9261_v36  ;;  %5915 = vmatmul.bf16.vlgmr.msra.gmra.mxu3 %v208_v43  ;;  %v9300_v36 = vld [vmem:[#allocation4 + $0xef0] sm:$0xff]  ;;  %v9274_v43 = vld [vmem:[#allocation4 + $0xe20] sm:$0xff] }
 0x1b6   :  { %5959 = vmatpush.bf16.msrb.mxu3 %v9269_v41 }
 0x1b7   :  { %5921 = vmatpush.bf16.msrb.mxu0 %v9244_v44  ;;  %v5695_v0 = vpop.f32.mrf.mxu2  ;;  %v5671_v4 = vpop.f32.mrf.mxu0 }
 0x1b8   :  { %5934 = vmatpush.bf16.msrb.mxu1 %v9252_v45  ;;  %v5696_v1 = vadd.f32 %v5695_v0, %v5683_v59  ;;  %v5708_v3 = vpop.f32.mrf.mxu3  ;;  %v5684_v7 = vpop.f32.mrf.mxu1  ;;  %v9282_v45 = vld [vmem:[#allocation4 + $0xe60] sm:$0xff]  ;;  %v9279_v0 = vld [vmem:[#allocation4 + $0xe48] sm:$0xff] }
 0x1b9   :  { %5947 = vmatpush.bf16.msrb.mxu2 %v9260_v46  ;;  %v9290_v46 = vld [vmem:[#allocation4 + $0xea0] sm:$0xff] }
 0x1ba   :  { %5960 = vmatpush.bf16.msrb.mxu3 %v9268_v47  ;;  %v9623_v5 = vadd.f32 %v5708_v3, %v5696_v1  ;;  %v9287_v1 = vld [vmem:[#allocation4 + $0xe88] sm:$0xff]  ;;  %v9286_v7 = vld [vmem:[#allocation4 + $0xe80] sm:$0xff] }
 0x1bb   :  { %5922 = vmatpush.bf16.msrb.mxu0 %v9243_v48  ;;  %v9298_v48 = vld [vmem:[#allocation4 + $0xee0] sm:$0xff]  ;;  %v9295_v3 = vld [vmem:[#allocation4 + $0xec8] sm:$0xff] }
 0x1bc   :  { %5935 = vmatpush.bf16.msrb.mxu1 %v9251_v49  ;;  %v9273_v49 = vld [vmem:[#allocation4 + $0xe18] sm:$0xff] }
 0x1bd   :  { %5948 = vmatpush.bf16.msrb.mxu2 %v9259_v50  ;;  %v9281_v50 = vld [vmem:[#allocation4 + $0xe58] sm:$0xff] }
 0x1be   :  { %5961 = vmatpush.bf16.msrb.mxu3 %v9267_v52 }
 0x1bf   :  { %5923 = vmatpush.bf16.msrb.mxu0 %v9242_v55  ;;  %v5697_v14 = vpop.f32.mrf.mxu2 }
 0x1c0   :  { %5936 = vmatpush.bf16.msrb.mxu1 %v9250_v57  ;;  %v5710_v16 = vpop.f32.mrf.mxu3  ;;  %v9294_v14 = vld [vmem:[#allocation4 + $0xec0] sm:$0xff] }
 0x1c1   :  { %5949 = vmatpush.bf16.msrb.mxu2 %v9258_v58  ;;  %v9272_v58 = vld [vmem:[#allocation4 + $0xe10] sm:$0xff] }
 0x1c2   :  { %5962 = vmatpush.bf16.msrb.mxu3 %v9266_v60  ;;  %v9280_v60 = vld [vmem:[#allocation4 + $0xe50] sm:$0xff] }
 0x1c3   :  { %5924 = vmatpush.bf16.msrb.mxu0 %v9241_v61  ;;  %v9288_v61 = vld [vmem:[#allocation4 + $0xe90] sm:$0xff] }
 0x1c4   :  { %5937 = vmatpush.bf16.msrb.mxu1 %v9249_v62  ;;  %v9296_v62 = vld [vmem:[#allocation4 + $0xed0] sm:$0xff] }
 0x1c5   :  { %5950 = vmatpush.bf16.msrb.mxu2 %v9257_v63  ;;  %v9271_v63 = vld [vmem:[#allocation4 + $0xe08] sm:$0xff] }
 0x1c6   :  { %5963 = vmatpush.bf16.msrb.mxu3 %v9265_v2 }
 0x1c7   :  { %5925 = vmatpush.bf16.msrb.mxu0 %v9240_v6  ;;  %v9278_v6 = vld [vmem:[#allocation4 + $0xe40] sm:$0xff] }
 0x1c8   :  { %5938 = vmatpush.bf16.msrb.mxu1 %v9248_v8  ;;  %v134_v8 = vld [vmem:[#allocation2 + $0x1c0] sm:$0xff] }
 0x1c9   :  { %5951 = vmatpush.bf16.msrb.mxu2 %v9256_v9  ;;  %v136_v9 = vld [vmem:[#allocation2 + $0x1d0] sm:$0xff]  ;;  %v213_v16 = vpack.c.bf16 %v134_v8, %v134_v8 }
 0x1ca   :  { %5964 = vmatpush.bf16.msrb.mxu3 %v9264_v10  ;;  %v9309_v10 = vld [vmem:[#allocation4 + $0xf38] sm:$0xff] }
 0x1cb   :  { %5926 = vmatpush.bf16.msrb.mxu0 %v9239_v11  ;;  %v9317_v11 = vld [vmem:[#allocation4 + $0xf78] sm:$0xff] }
 0x1cc   :  { %5939 = vmatpush.bf16.msrb.mxu1 %v9247_v12  ;;  %v135_v12 = vld [vmem:[#allocation2 + $0x1c8] sm:$0xff] }
 0x1cd   :  { %5952 = vmatpush.bf16.msrb.mxu2 %v9255_v13  ;;  %v9325_v13 = vld [vmem:[#allocation4 + $0xfb8] sm:$0xff] }
 0x1ce   :  { %5965 = vmatpush.bf16.msrb.mxu3 %v9263_v15  ;;  %v137_v15 = vld [vmem:[#allocation2 + $0x1d8] sm:$0xff] }
 0x1cf   :  { %5927 = vmatpush.bf16.msrb.mxu0 %v9238_v17  ;;  %v5721_v41 = vpop.f32.mrf.mxu0  ;;  %v215_v17 = vpack.c.bf16 %v136_v9, %v136_v9  ;;  %v216_v20 = vpack.c.bf16 %v137_v15, %v137_v15  ;;  %v9340_v9 = vld [vmem:[#allocation4 + $0x1030] sm:$0xff]  ;;  %v9355_v15 = vld [vmem:[#allocation4 + $0x10a8] sm:$0xff] }
 0x1d0   :  { %5940 = vmatpush.bf16.msrb.mxu1 %v9246_v18  ;;  %v5722_v42 = vadd.f32 %v5721_v41, %v9623_v5  ;;  %v5734_v44 = vpop.f32.mrf.mxu1  ;;  %v9270_v5 = vld [vmem:[#allocation4 + $0xe00] sm:$0xff]  ;;  %v9333_v18 = vld [vmem:[#allocation4 + $0xff8] sm:$0xff] }
 0x1d1   :  { %5953 = vmatpush.bf16.msrb.mxu2 %v9254_v19  ;;  %v214_v19 = vpack.c.bf16 %v135_v12, %v135_v12  ;;  %v9364_v12 = vld [vmem:[#allocation4 + $0x10f0] sm:$0xff] }
 0x1d2   :  { %5966 = vmatpush.bf16.msrb.mxu3 %v9262_v26  ;;  %5928 = vmatmul.bf16.vlgmr.msrb.gmra.mxu0 %v209_v28  ;;  %v5735_v47 = vadd.f32 %v5734_v44, %v5722_v42  ;;  %v9315_v26 = vld [vmem:[#allocation4 + $0xf68] sm:$0xff]  ;;  %v9329_v42 = vld [vmem:[#allocation4 + $0xfd8] sm:$0xff] }
 0x1d3   :  { %5972 = vmatpush.bf16.msra.mxu0 %v9277_v22  ;;  %5941 = vmatmul.bf16.vlgmr.msrb.gmra.mxu1 %v210_v31  ;;  %v9316_v22 = vld [vmem:[#allocation4 + $0xf70] sm:$0xff]  ;;  %v9331_v28 = vld [vmem:[#allocation4 + $0xfe8] sm:$0xff]  ;;  %v9306_v31 = vld [vmem:[#allocation4 + $0xf20] sm:$0xff] }
 0x1d4   :  { %5985 = vmatpush.bf16.msra.mxu1 %v9285_v23  ;;  %5954 = vmatmul.bf16.vlgmr.msrb.gmra.mxu2 %v211_v29  ;;  %v9324_v23 = vld [vmem:[#allocation4 + $0xfb0] sm:$0xff] }
 0x1d5   :  { %5998 = vmatpush.bf16.msra.mxu2 %v9293_v25  ;;  %5967 = vmatmul.bf16.vlgmr.msrb.gmra.mxu3 %v212_v32  ;;  %v9307_v25 = vld [vmem:[#allocation4 + $0xf28] sm:$0xff] }
 0x1d6   :  { %6011 = vmatpush.bf16.msra.mxu3 %v9301_v30 }
 0x1d7   :  { %5973 = vmatpush.bf16.msra.mxu0 %v9276_v33  ;;  %v5747_v52 = vpop.f32.mrf.mxu2  ;;  %v5723_v56 = vpop.f32.mrf.mxu0  ;;  %v9314_v33 = vld [vmem:[#allocation4 + $0xf60] sm:$0xff] }
 0x1d8   :  { %5986 = vmatpush.bf16.msra.mxu1 %v9284_v34  ;;  %v5748_v53 = vadd.f32 %v5747_v52, %v5735_v47  ;;  %v5760_v55 = vpop.f32.mrf.mxu3  ;;  %v5736_v59 = vpop.f32.mrf.mxu1  ;;  %v9322_v34 = vld [vmem:[#allocation4 + $0xfa0] sm:$0xff]  ;;  %v9311_v52 = vld [vmem:[#allocation4 + $0xf48] sm:$0xff] }
 0x1d9   :  { %5999 = vmatpush.bf16.msra.mxu2 %v9292_v35  ;;  %v9318_v59 = vld [vmem:[#allocation4 + $0xf80] sm:$0xff] }
 0x1da   :  { %6012 = vmatpush.bf16.msra.mxu3 %v9300_v36  ;;  %v9626_v57 = vadd.f32 %v5760_v55, %v5748_v53  ;;  %v9330_v36 = vld [vmem:[#allocation4 + $0xfe0] sm:$0xff]  ;;  %v9319_v53 = vld [vmem:[#allocation4 + $0xf88] sm:$0xff] }
 0x1db   :  { %5974 = vmatpush.bf16.msra.mxu0 %v9275_v37  ;;  %v9305_v37 = vld [vmem:[#allocation4 + $0xf18] sm:$0xff]  ;;  %v9327_v55 = vld [vmem:[#allocation4 + $0xfc8] sm:$0xff] }
 0x1dc   :  { %5987 = vmatpush.bf16.msra.mxu1 %v9283_v38  ;;  %v9313_v38 = vld [vmem:[#allocation4 + $0xf58] sm:$0xff] }
 0x1dd   :  { %6000 = vmatpush.bf16.msra.mxu2 %v9291_v39  ;;  %v9321_v39 = vld [vmem:[#allocation4 + $0xf98] sm:$0xff] }
 0x1de   :  { %6013 = vmatpush.bf16.msra.mxu3 %v9299_v40 }
 0x1df   :  { %5975 = vmatpush.bf16.msra.mxu0 %v9274_v43  ;;  %v5749_v2 = vpop.f32.mrf.mxu2 }
 0x1e0   :  { %5988 = vmatpush.bf16.msra.mxu1 %v9282_v45  ;;  %v5762_v4 = vpop.f32.mrf.mxu3  ;;  %v9326_v2 = vld [vmem:[#allocation4 + $0xfc0] sm:$0xff] }
 0x1e1   :  { %6001 = vmatpush.bf16.msra.mxu2 %v9290_v46  ;;  %v9304_v46 = vld [vmem:[#allocation4 + $0xf10] sm:$0xff] }
 0x1e2   :  { %6014 = vmatpush.bf16.msra.mxu3 %v9298_v48  ;;  %v9312_v48 = vld [vmem:[#allocation4 + $0xf50] sm:$0xff] }
 0x1e3   :  { %5976 = vmatpush.bf16.msra.mxu0 %v9273_v49  ;;  %v9320_v49 = vld [vmem:[#allocation4 + $0xf90] sm:$0xff] }
 0x1e4   :  { %5989 = vmatpush.bf16.msra.mxu1 %v9281_v50  ;;  %v9328_v50 = vld [vmem:[#allocation4 + $0xfd0] sm:$0xff] }
 0x1e5   :  { %6002 = vmatpush.bf16.msra.mxu2 %v9289_v51  ;;  %v9303_v51 = vld [vmem:[#allocation4 + $0xf08] sm:$0xff] }
 0x1e6   :  { %6015 = vmatpush.bf16.msra.mxu3 %v9297_v54 }
 0x1e7   :  { %5977 = vmatpush.bf16.msra.mxu0 %v9272_v58  ;;  %v9310_v58 = vld [vmem:[#allocation4 + $0xf40] sm:$0xff] }
 0x1e8   :  { %5990 = vmatpush.bf16.msra.mxu1 %v9280_v60  ;;  %v138_v60 = vld [vmem:[#allocation2 + $0x1e0] sm:$0xff] }
 0x1e9   :  { %6003 = vmatpush.bf16.msra.mxu2 %v9288_v61  ;;  %v140_v61 = vld [vmem:[#allocation2 + $0x1f0] sm:$0xff]  ;;  %v217_v4 = vpack.c.bf16 %v138_v60, %v138_v60 }
 0x1ea   :  { %6016 = vmatpush.bf16.msra.mxu3 %v9296_v62  ;;  %v9341_v62 = vld [vmem:[#allocation4 + $0x1038] sm:$0xff] }
 0x1eb   :  { %5978 = vmatpush.bf16.msra.mxu0 %v9271_v63  ;;  %v9349_v63 = vld [vmem:[#allocation4 + $0x1078] sm:$0xff] }
 0x1ec   :  { %5991 = vmatpush.bf16.msra.mxu1 %v9279_v0  ;;  %v139_v0 = vld [vmem:[#allocation2 + $0x1e8] sm:$0xff] }
 0x1ed   :  { %6004 = vmatpush.bf16.msra.mxu2 %v9287_v1  ;;  %v9357_v1 = vld [vmem:[#allocation4 + $0x10b8] sm:$0xff] }
 0x1ee   :  { %6017 = vmatpush.bf16.msra.mxu3 %v9295_v3  ;;  %v141_v3 = vld [vmem:[#allocation2 + $0x1f8] sm:$0xff] }
 0x1ef   :  { %5979 = vmatpush.bf16.msra.mxu0 %v9270_v5  ;;  %v5773_v29 = vpop.f32.mrf.mxu0  ;;  %v219_v5 = vpack.c.bf16 %v140_v61, %v140_v61  ;;  %v220_v8 = vpack.c.bf16 %v141_v3, %v141_v3  ;;  %v9372_v61 = vld [vmem:[#allocation4 + $0x1130] sm:$0xff]  ;;  %v9387_v3 = vld [vmem:[#allocation4 + $0x11a8] sm:$0xff] }
 0x1f0   :  { %5992 = vmatpush.bf16.msra.mxu1 %v9278_v6  ;;  %v5774_v30 = vadd.f32 %v5773_v29, %v9626_v57  ;;  %v5786_v32 = vpop.f32.mrf.mxu1  ;;  %v9302_v57 = vld [vmem:[#allocation4 + $0xf00] sm:$0xff]  ;;  %v9365_v6 = vld [vmem:[#allocation4 + $0x10f8] sm:$0xff] }
 0x1f1   :  { %6005 = vmatpush.bf16.msra.mxu2 %v9286_v7  ;;  %v218_v7 = vpack.c.bf16 %v139_v0, %v139_v0  ;;  %v9396_v0 = vld [vmem:[#allocation4 + $0x11f0] sm:$0xff] }
 0x1f2   :  { %6018 = vmatpush.bf16.msra.mxu3 %v9294_v14  ;;  %5980 = vmatmul.bf16.vlgmr.msra.gmra.mxu0 %v213_v16  ;;  %v5787_v35 = vadd.f32 %v5786_v32, %v5774_v30  ;;  %v9347_v14 = vld [vmem:[#allocation4 + $0x1068] sm:$0xff]  ;;  %v9361_v30 = vld [vmem:[#allocation4 + $0x10d8] sm:$0xff] }
 0x1f3   :  { %6024 = vmatpush.bf16.msrb.mxu0 %v9309_v10  ;;  %5993 = vmatmul.bf16.vlgmr.msra.gmra.mxu1 %v214_v19  ;;  %v9348_v10 = vld [vmem:[#allocation4 + $0x1070] sm:$0xff]  ;;  %v9363_v16 = vld [vmem:[#allocation4 + $0x10e8] sm:$0xff]  ;;  %v9338_v19 = vld [vmem:[#allocation4 + $0x1020] sm:$0xff] }
 0x1f4   :  { %6037 = vmatpush.bf16.msrb.mxu1 %v9317_v11  ;;  %6006 = vmatmul.bf16.vlgmr.msra.gmra.mxu2 %v215_v17  ;;  %v9356_v11 = vld [vmem:[#allocation4 + $0x10b0] sm:$0xff] }
 0x1f5   :  { %6050 = vmatpush.bf16.msrb.mxu2 %v9325_v13  ;;  %6019 = vmatmul.bf16.vlgmr.msra.gmra.mxu3 %v216_v20  ;;  %v9339_v13 = vld [vmem:[#allocation4 + $0x1028] sm:$0xff] }
 0x1f6   :  { %6063 = vmatpush.bf16.msrb.mxu3 %v9333_v18 }
 0x1f7   :  { %6025 = vmatpush.bf16.msrb.mxu0 %v9308_v21  ;;  %v5799_v40 = vpop.f32.mrf.mxu2  ;;  %v5775_v44 = vpop.f32.mrf.mxu0  ;;  %v9346_v21 = vld [vmem:[#allocation4 + $0x1060] sm:$0xff] }
 0x1f8   :  { %6038 = vmatpush.bf16.msrb.mxu1 %v9316_v22  ;;  %v5800_v41 = vadd.f32 %v5799_v40, %v5787_v35  ;;  %v5812_v43 = vpop.f32.mrf.mxu3  ;;  %v5788_v47 = vpop.f32.mrf.mxu1  ;;  %v9354_v22 = vld [vmem:[#allocation4 + $0x10a0] sm:$0xff]  ;;  %v9343_v40 = vld [vmem:[#allocation4 + $0x1048] sm:$0xff] }
 0x1f9   :  { %6051 = vmatpush.bf16.msrb.mxu2 %v9324_v23  ;;  %v9350_v47 = vld [vmem:[#allocation4 + $0x1080] sm:$0xff] }
 0x1fa   :  { %6064 = vmatpush.bf16.msrb.mxu3 %v9332_v24  ;;  %v9629_v45 = vadd.f32 %v5812_v43, %v5800_v41  ;;  %v9362_v24 = vld [vmem:[#allocation4 + $0x10e0] sm:$0xff]  ;;  %v9351_v41 = vld [vmem:[#allocation4 + $0x1088] sm:$0xff] }
 0x1fb   :  { %6026 = vmatpush.bf16.msrb.mxu0 %v9307_v25  ;;  %v9337_v25 = vld [vmem:[#allocation4 + $0x1018] sm:$0xff]  ;;  %v9359_v43 = vld [vmem:[#allocation4 + $0x10c8] sm:$0xff] }
 0x1fc   :  { %6039 = vmatpush.bf16.msrb.mxu1 %v9315_v26  ;;  %v9345_v26 = vld [vmem:[#allocation4 + $0x1058] sm:$0xff] }
 0x1fd   :  { %6052 = vmatpush.bf16.msrb.mxu2 %v9323_v27  ;;  %v9353_v27 = vld [vmem:[#allocation4 + $0x1098] sm:$0xff] }
 0x1fe   :  { %6065 = vmatpush.bf16.msrb.mxu3 %v9331_v28 }
 0x1ff   :  { %6027 = vmatpush.bf16.msrb.mxu0 %v9306_v31  ;;  %v5801_v54 = vpop.f32.mrf.mxu2 }
 0x200   :  { %6040 = vmatpush.bf16.msrb.mxu1 %v9314_v33  ;;  %v5814_v56 = vpop.f32.mrf.mxu3  ;;  %v9358_v54 = vld [vmem:[#allocation4 + $0x10c0] sm:$0xff] }
 0x201   :  { %6053 = vmatpush.bf16.msrb.mxu2 %v9322_v34  ;;  %v9336_v34 = vld [vmem:[#allocation4 + $0x1010] sm:$0xff] }
 0x202   :  { %6066 = vmatpush.bf16.msrb.mxu3 %v9330_v36  ;;  %v9344_v36 = vld [vmem:[#allocation4 + $0x1050] sm:$0xff] }
 0x203   :  { %6028 = vmatpush.bf16.msrb.mxu0 %v9305_v37  ;;  %v9352_v37 = vld [vmem:[#allocation4 + $0x1090] sm:$0xff] }
 0x204   :  { %6041 = vmatpush.bf16.msrb.mxu1 %v9313_v38  ;;  %v9360_v38 = vld [vmem:[#allocation4 + $0x10d0] sm:$0xff] }
 0x205   :  { %6054 = vmatpush.bf16.msrb.mxu2 %v9321_v39  ;;  %v9335_v39 = vld [vmem:[#allocation4 + $0x1008] sm:$0xff] }
 0x206   :  { %6067 = vmatpush.bf16.msrb.mxu3 %v9329_v42 }
 0x207   :  { %6029 = vmatpush.bf16.msrb.mxu0 %v9304_v46  ;;  %v9342_v46 = vld [vmem:[#allocation4 + $0x1040] sm:$0xff] }
 0x208   :  { %6042 = vmatpush.bf16.msrb.mxu1 %v9312_v48  ;;  %v142_v48 = vld [vmem:[#allocation2 + $0x200] sm:$0xff] }
 0x209   :  { %6055 = vmatpush.bf16.msrb.mxu2 %v9320_v49  ;;  %v144_v49 = vld [vmem:[#allocation2 + $0x210] sm:$0xff]  ;;  %v221_v56 = vpack.c.bf16 %v142_v48, %v142_v48 }
 0x20a   :  { %6068 = vmatpush.bf16.msrb.mxu3 %v9328_v50  ;;  %v9373_v50 = vld [vmem:[#allocation4 + $0x1138] sm:$0xff] }
 0x20b   :  { %6030 = vmatpush.bf16.msrb.mxu0 %v9303_v51  ;;  %v9381_v51 = vld [vmem:[#allocation4 + $0x1178] sm:$0xff] }
 0x20c   :  { %6043 = vmatpush.bf16.msrb.mxu1 %v9311_v52  ;;  %v143_v52 = vld [vmem:[#allocation2 + $0x208] sm:$0xff] }
 0x20d   :  { %6056 = vmatpush.bf16.msrb.mxu2 %v9319_v53  ;;  %v9389_v53 = vld [vmem:[#allocation4 + $0x11b8] sm:$0xff] }
 0x20e   :  { %6069 = vmatpush.bf16.msrb.mxu3 %v9327_v55  ;;  %v145_v55 = vld [vmem:[#allocation2 + $0x218] sm:$0xff] }
 0x20f   :  { %6031 = vmatpush.bf16.msrb.mxu0 %v9302_v57  ;;  %v5825_v17 = vpop.f32.mrf.mxu0  ;;  %v223_v57 = vpack.c.bf16 %v144_v49, %v144_v49  ;;  %v224_v60 = vpack.c.bf16 %v145_v55, %v145_v55  ;;  %v9404_v49 = vld [vmem:[#allocation4 + $0x1230] sm:$0xff]  ;;  %v9419_v55 = vld [vmem:[#allocation4 + $0x12a8] sm:$0xff] }
 0x210   :  { %6044 = vmatpush.bf16.msrb.mxu1 %v9310_v58  ;;  %v5826_v18 = vadd.f32 %v5825_v17, %v9629_v45  ;;  %v5838_v20 = vpop.f32.mrf.mxu1  ;;  %v9334_v45 = vld [vmem:[#allocation4 + $0x1000] sm:$0xff]  ;;  %v9397_v58 = vld [vmem:[#allocation4 + $0x11f8] sm:$0xff] }
 0x211   :  { %6057 = vmatpush.bf16.msrb.mxu2 %v9318_v59  ;;  %v222_v59 = vpack.c.bf16 %v143_v52, %v143_v52  ;;  %v9428_v52 = vld [vmem:[#allocation4 + $0x12f0] sm:$0xff] }
 0x212   :  { %6070 = vmatpush.bf16.msrb.mxu3 %v9326_v2  ;;  %6032 = vmatmul.bf16.vlgmr.msrb.gmra.mxu0 %v217_v4  ;;  %v5839_v23 = vadd.f32 %v5838_v20, %v5826_v18  ;;  %v9379_v2 = vld [vmem:[#allocation4 + $0x1168] sm:$0xff]  ;;  %v9393_v18 = vld [vmem:[#allocation4 + $0x11d8] sm:$0xff] }
 0x213   :  { %6076 = vmatpush.bf16.msra.mxu0 %v9341_v62  ;;  %6045 = vmatmul.bf16.vlgmr.msrb.gmra.mxu1 %v218_v7  ;;  %v9380_v62 = vld [vmem:[#allocation4 + $0x1170] sm:$0xff]  ;;  %v9395_v4 = vld [vmem:[#allocation4 + $0x11e8] sm:$0xff]  ;;  %v9370_v7 = vld [vmem:[#allocation4 + $0x1120] sm:$0xff] }
 0x214   :  { %6089 = vmatpush.bf16.msra.mxu1 %v9349_v63  ;;  %6058 = vmatmul.bf16.vlgmr.msrb.gmra.mxu2 %v219_v5  ;;  %v9388_v63 = vld [vmem:[#allocation4 + $0x11b0] sm:$0xff] }
 0x215   :  { %6102 = vmatpush.bf16.msra.mxu2 %v9357_v1  ;;  %6071 = vmatmul.bf16.vlgmr.msrb.gmra.mxu3 %v220_v8  ;;  %v9371_v1 = vld [vmem:[#allocation4 + $0x1128] sm:$0xff] }
 0x216   :  { %6115 = vmatpush.bf16.msra.mxu3 %v9365_v6 }
 0x217   :  { %6077 = vmatpush.bf16.msra.mxu0 %v9340_v9  ;;  %v5851_v28 = vpop.f32.mrf.mxu2  ;;  %v5827_v32 = vpop.f32.mrf.mxu0  ;;  %v9378_v9 = vld [vmem:[#allocation4 + $0x1160] sm:$0xff] }
 0x218   :  { %6090 = vmatpush.bf16.msra.mxu1 %v9348_v10  ;;  %v5852_v29 = vadd.f32 %v5851_v28, %v5839_v23  ;;  %v5864_v31 = vpop.f32.mrf.mxu3  ;;  %v5840_v35 = vpop.f32.mrf.mxu1  ;;  %v9386_v10 = vld [vmem:[#allocation4 + $0x11a0] sm:$0xff]  ;;  %v9375_v28 = vld [vmem:[#allocation4 + $0x1148] sm:$0xff] }
 0x219   :  { %6103 = vmatpush.bf16.msra.mxu2 %v9356_v11  ;;  %v9382_v35 = vld [vmem:[#allocation4 + $0x1180] sm:$0xff] }
 0x21a   :  { %6116 = vmatpush.bf16.msra.mxu3 %v9364_v12  ;;  %v9632_v33 = vadd.f32 %v5864_v31, %v5852_v29  ;;  %v9394_v12 = vld [vmem:[#allocation4 + $0x11e0] sm:$0xff]  ;;  %v9383_v29 = vld [vmem:[#allocation4 + $0x1188] sm:$0xff] }
 0x21b   :  { %6078 = vmatpush.bf16.msra.mxu0 %v9339_v13  ;;  %v9369_v13 = vld [vmem:[#allocation4 + $0x1118] sm:$0xff]  ;;  %v9391_v31 = vld [vmem:[#allocation4 + $0x11c8] sm:$0xff] }
 0x21c   :  { %6091 = vmatpush.bf16.msra.mxu1 %v9347_v14  ;;  %v9377_v14 = vld [vmem:[#allocation4 + $0x1158] sm:$0xff] }
 0x21d   :  { %6104 = vmatpush.bf16.msra.mxu2 %v9355_v15  ;;  %v9385_v15 = vld [vmem:[#allocation4 + $0x1198] sm:$0xff] }
 0x21e   :  { %6117 = vmatpush.bf16.msra.mxu3 %v9363_v16 }
 0x21f   :  { %6079 = vmatpush.bf16.msra.mxu0 %v9338_v19  ;;  %v5853_v42 = vpop.f32.mrf.mxu2 }
 0x220   :  { %6092 = vmatpush.bf16.msra.mxu1 %v9346_v21  ;;  %v5866_v44 = vpop.f32.mrf.mxu3  ;;  %v9390_v42 = vld [vmem:[#allocation4 + $0x11c0] sm:$0xff] }
 0x221   :  { %6105 = vmatpush.bf16.msra.mxu2 %v9354_v22  ;;  %v9368_v22 = vld [vmem:[#allocation4 + $0x1110] sm:$0xff] }
 0x222   :  { %6118 = vmatpush.bf16.msra.mxu3 %v9362_v24  ;;  %v9376_v24 = vld [vmem:[#allocation4 + $0x1150] sm:$0xff] }
 0x223   :  { %6080 = vmatpush.bf16.msra.mxu0 %v9337_v25  ;;  %v9384_v25 = vld [vmem:[#allocation4 + $0x1190] sm:$0xff] }
 0x224   :  { %6093 = vmatpush.bf16.msra.mxu1 %v9345_v26  ;;  %v9392_v26 = vld [vmem:[#allocation4 + $0x11d0] sm:$0xff] }
 0x225   :  { %6106 = vmatpush.bf16.msra.mxu2 %v9353_v27  ;;  %v9367_v27 = vld [vmem:[#allocation4 + $0x1108] sm:$0xff] }
 0x226   :  { %6119 = vmatpush.bf16.msra.mxu3 %v9361_v30 }
 0x227   :  { %6081 = vmatpush.bf16.msra.mxu0 %v9336_v34  ;;  %v9374_v34 = vld [vmem:[#allocation4 + $0x1140] sm:$0xff] }
 0x228   :  { %6094 = vmatpush.bf16.msra.mxu1 %v9344_v36  ;;  %v146_v36 = vld [vmem:[#allocation2 + $0x220] sm:$0xff] }
 0x229   :  { %6107 = vmatpush.bf16.msra.mxu2 %v9352_v37  ;;  %v148_v37 = vld [vmem:[#allocation2 + $0x230] sm:$0xff]  ;;  %v225_v44 = vpack.c.bf16 %v146_v36, %v146_v36  ;;  %v9436_v36 = vld [vmem:[#allocation4 + $0x1330] sm:$0xff] }
 0x22a   :  { %6120 = vmatpush.bf16.msra.mxu3 %v9360_v38  ;;  %v9405_v38 = vld [vmem:[#allocation4 + $0x1238] sm:$0xff] }
 0x22b   :  { %6082 = vmatpush.bf16.msra.mxu0 %v9335_v39  ;;  %v9413_v39 = vld [vmem:[#allocation4 + $0x1278] sm:$0xff] }
 0x22c   :  { %6095 = vmatpush.bf16.msra.mxu1 %v9343_v40  ;;  %v147_v40 = vld [vmem:[#allocation2 + $0x228] sm:$0xff] }
 0x22d   :  { %6108 = vmatpush.bf16.msra.mxu2 %v9351_v41  ;;  %v9421_v41 = vld [vmem:[#allocation4 + $0x12b8] sm:$0xff] }
 0x22e   :  { %6121 = vmatpush.bf16.msra.mxu3 %v9359_v43  ;;  %v149_v43 = vld [vmem:[#allocation2 + $0x238] sm:$0xff] }
 0x22f   :  { %6083 = vmatpush.bf16.msra.mxu0 %v9334_v45  ;;  %v5877_v5 = vpop.f32.mrf.mxu0  ;;  %v227_v45 = vpack.c.bf16 %v148_v37, %v148_v37  ;;  %v228_v48 = vpack.c.bf16 %v149_v43, %v149_v43  ;;  %v9444_v37 = vld [vmem:[#allocation4 + $0x1370] sm:$0xff] }
 0x230   :  { %6096 = vmatpush.bf16.msra.mxu1 %v9342_v46  ;;  %v5878_v6 = vadd.f32 %v5877_v5, %v9632_v33  ;;  %v5890_v8 = vpop.f32.mrf.mxu1  ;;  %v9366_v33 = vld [vmem:[#allocation4 + $0x1100] sm:$0xff]  ;;  %v9429_v46 = vld [vmem:[#allocation4 + $0x12f8] sm:$0xff] }
 0x231   :  { %6109 = vmatpush.bf16.msra.mxu2 %v9350_v47  ;;  %v226_v47 = vpack.c.bf16 %v147_v40, %v147_v40 }
 0x232   :  { %6122 = vmatpush.bf16.msra.mxu3 %v9358_v54  ;;  %6084 = vmatmul.bf16.vlgmr.msra.gmra.mxu0 %v221_v56  ;;  %v5891_v11 = vadd.f32 %v5890_v8, %v5878_v6  ;;  %v9411_v54 = vld [vmem:[#allocation4 + $0x1268] sm:$0xff]  ;;  %v9425_v6 = vld [vmem:[#allocation4 + $0x12d8] sm:$0xff] }
 0x233   :  { %6128 = vmatpush.bf16.msrb.mxu0 %v9373_v50  ;;  %6097 = vmatmul.bf16.vlgmr.msra.gmra.mxu1 %v222_v59  ;;  %v9412_v50 = vld [vmem:[#allocation4 + $0x1270] sm:$0xff]  ;;  %v9427_v56 = vld [vmem:[#allocation4 + $0x12e8] sm:$0xff]  ;;  %v9402_v59 = vld [vmem:[#allocation4 + $0x1220] sm:$0xff] }
 0x234   :  { %6141 = vmatpush.bf16.msrb.mxu1 %v9381_v51  ;;  %6110 = vmatmul.bf16.vlgmr.msra.gmra.mxu2 %v223_v57  ;;  %v9420_v51 = vld [vmem:[#allocation4 + $0x12b0] sm:$0xff] }
 0x235   :  { %6154 = vmatpush.bf16.msrb.mxu2 %v9389_v53  ;;  %6123 = vmatmul.bf16.vlgmr.msra.gmra.mxu3 %v224_v60  ;;  %v9403_v53 = vld [vmem:[#allocation4 + $0x1228] sm:$0xff] }
 0x236   :  { %6167 = vmatpush.bf16.msrb.mxu3 %v9397_v58 }
 0x237   :  { %6129 = vmatpush.bf16.msrb.mxu0 %v9372_v61  ;;  %v5903_v16 = vpop.f32.mrf.mxu2  ;;  %v5879_v20 = vpop.f32.mrf.mxu0  ;;  %v9410_v61 = vld [vmem:[#allocation4 + $0x1260] sm:$0xff] }
 0x238   :  { %6142 = vmatpush.bf16.msrb.mxu1 %v9380_v62  ;;  %v5904_v17 = vadd.f32 %v5903_v16, %v5891_v11  ;;  %v5916_v19 = vpop.f32.mrf.mxu3  ;;  %v5892_v23 = vpop.f32.mrf.mxu1  ;;  %v9418_v62 = vld [vmem:[#allocation4 + $0x12a0] sm:$0xff]  ;;  %v9407_v16 = vld [vmem:[#allocation4 + $0x1248] sm:$0xff] }
 0x239   :  { %6155 = vmatpush.bf16.msrb.mxu2 %v9388_v63  ;;  %v150_v23 = vld [vmem:[#allocation2 + $0x240] sm:$0xff] }
 0x23a   :  { %6168 = vmatpush.bf16.msrb.mxu3 %v9396_v0  ;;  %v9635_v21 = vadd.f32 %v5916_v19, %v5904_v17  ;;  %v9426_v0 = vld [vmem:[#allocation4 + $0x12e0] sm:$0xff]  ;;  %v9415_v17 = vld [vmem:[#allocation4 + $0x1288] sm:$0xff] }
 0x23b   :  { %6130 = vmatpush.bf16.msrb.mxu0 %v9371_v1  ;;  %v9401_v1 = vld [vmem:[#allocation4 + $0x1218] sm:$0xff]  ;;  %v9423_v19 = vld [vmem:[#allocation4 + $0x12c8] sm:$0xff] }
 0x23c   :  { %6143 = vmatpush.bf16.msrb.mxu1 %v9379_v2  ;;  %v9409_v2 = vld [vmem:[#allocation4 + $0x1258] sm:$0xff] }
 0x23d   :  { %6156 = vmatpush.bf16.msrb.mxu2 %v9387_v3  ;;  %v9417_v3 = vld [vmem:[#allocation4 + $0x1298] sm:$0xff] }
 0x23e   :  { %6169 = vmatpush.bf16.msrb.mxu3 %v9395_v4 }
 0x23f   :  { %6131 = vmatpush.bf16.msrb.mxu0 %v9370_v7  ;;  %v5905_v30 = vpop.f32.mrf.mxu2 }
 0x240   :  { %6144 = vmatpush.bf16.msrb.mxu1 %v9378_v9  ;;  %v5918_v32 = vpop.f32.mrf.mxu3  ;;  %v229_v30 = vpack.c.bf16 %v150_v23, %v150_v23 }
 0x241   :  { %6157 = vmatpush.bf16.msrb.mxu2 %v9386_v10  ;;  %v9400_v10 = vld [vmem:[#allocation4 + $0x1210] sm:$0xff] }
 0x242   :  { %6170 = vmatpush.bf16.msrb.mxu3 %v9394_v12  ;;  %v9408_v12 = vld [vmem:[#allocation4 + $0x1250] sm:$0xff] }
 0x243   :  { %6132 = vmatpush.bf16.msrb.mxu0 %v9369_v13  ;;  %v9416_v13 = vld [vmem:[#allocation4 + $0x1290] sm:$0xff] }
 0x244   :  { %6145 = vmatpush.bf16.msrb.mxu1 %v9377_v14  ;;  %v9424_v14 = vld [vmem:[#allocation4 + $0x12d0] sm:$0xff] }
 0x245   :  { %6158 = vmatpush.bf16.msrb.mxu2 %v9385_v15  ;;  %v9399_v15 = vld [vmem:[#allocation4 + $0x1208] sm:$0xff] }
 0x246   :  { %6171 = vmatpush.bf16.msrb.mxu3 %v9393_v18 }
 0x247   :  { %6133 = vmatpush.bf16.msrb.mxu0 %v9368_v22  ;;  %v9406_v22 = vld [vmem:[#allocation4 + $0x1240] sm:$0xff] }
 0x248   :  { %6146 = vmatpush.bf16.msrb.mxu1 %v9376_v24  ;;  %v9414_v24 = vld [vmem:[#allocation4 + $0x1280] sm:$0xff] }
 0x249   :  { %6159 = vmatpush.bf16.msrb.mxu2 %v9384_v25  ;;  %v152_v25 = vld [vmem:[#allocation2 + $0x250] sm:$0xff] }
 0x24a   :  { %6172 = vmatpush.bf16.msrb.mxu3 %v9392_v26  ;;  %v151_v26 = vld [vmem:[#allocation2 + $0x248] sm:$0xff]  ;;  %v231_v32 = vpack.c.bf16 %v152_v25, %v152_v25 }
 0x24b   :  { %6134 = vmatpush.bf16.msrb.mxu0 %v9367_v27  ;;  %v9437_v27 = vld [vmem:[#allocation4 + $0x1338] sm:$0xff] }
 0x24c   :  { %6147 = vmatpush.bf16.msrb.mxu1 %v9375_v28  ;;  %v9445_v28 = vld [vmem:[#allocation4 + $0x1378] sm:$0xff] }
 0x24d   :  { %6160 = vmatpush.bf16.msrb.mxu2 %v9383_v29  ;;  %v9422_v29 = vld [vmem:[#allocation4 + $0x12c0] sm:$0xff] }
 0x24e   :  { %6173 = vmatpush.bf16.msrb.mxu3 %v9391_v31  ;;  %v153_v31 = vld [vmem:[#allocation2 + $0x258] sm:$0xff] }
 0x24f   :  { %6135 = vmatpush.bf16.msrb.mxu0 %v9366_v33  ;;  %v5929_v57 = vpop.f32.mrf.mxu0  ;;  %v230_v33 = vpack.c.bf16 %v151_v26, %v151_v26 }
 0x250   :  { %6148 = vmatpush.bf16.msrb.mxu1 %v9374_v34  ;;  %v5930_v58 = vadd.f32 %v5929_v57, %v9635_v21  ;;  %v5942_v60 = vpop.f32.mrf.mxu1  ;;  %v9398_v21 = vld [vmem:[#allocation4 + $0x1200] sm:$0xff]  ;;  %v9440_v57 = vld [vmem:[#allocation4 + $0x1350] sm:$0xff] }
 0x251   :  { %6161 = vmatpush.bf16.msrb.mxu2 %v9382_v35  ;;  %v9446_v34 = vld [vmem:[#allocation4 + $0x1380] sm:$0xff]  ;;  %v232_v35 = vpack.c.bf16 %v153_v31, %v153_v31  ;;  %v6285_v31 = vld [vmem:[%s9692_s3 + $0x68] sm:$0xff] }
 0x252   :  { %6174 = vmatpush.bf16.msrb.mxu3 %v9390_v42  ;;  %6136 = vmatmul.bf16.vlgmr.msrb.gmra.mxu0 %v225_v44  ;;  %v5943_v63 = vadd.f32 %v5942_v60, %v5930_v58  ;;  %v9434_v42 = vld [vmem:[#allocation4 + $0x1320] sm:$0xff]  ;;  %v9431_v58 = vld [vmem:[#allocation4 + $0x1308] sm:$0xff] }
 0x253   :  { %6180 = vmatpush.bf16.msra.mxu0 %v9405_v38  ;;  %6149 = vmatmul.bf16.vlgmr.msrb.gmra.mxu1 %v226_v47  ;;  %v9435_v38 = vld [vmem:[#allocation4 + $0x1328] sm:$0xff]  ;;  %v9442_v44 = vld [vmem:[#allocation4 + $0x1360] sm:$0xff]  ;;  %v9433_v47 = vld [vmem:[#allocation4 + $0x1318] sm:$0xff] }
 0x254   :  { %6193 = vmatpush.bf16.msra.mxu1 %v9413_v39  ;;  %6162 = vmatmul.bf16.vlgmr.msrb.gmra.mxu2 %v227_v45  ;;  %v9443_v39 = vld [vmem:[#allocation4 + $0x1368] sm:$0xff] }
 0x255   :  { %6206 = vmatpush.bf16.msra.mxu2 %v9421_v41  ;;  %6175 = vmatmul.bf16.vlgmr.msrb.gmra.mxu3 %v228_v48  ;;  %v9441_v48 = vld [vmem:[#allocation4 + $0x1358] sm:$0xff] }
 0x256   :  { %6219 = vmatpush.bf16.msra.mxu3 %v9429_v46  ;;  %v156_v46 = vld [vmem:[#allocation2 + $0x270] sm:$0xff] }
 0x257   :  { %6181 = vmatpush.bf16.msra.mxu0 %v9404_v49  ;;  %v5955_v4 = vpop.f32.mrf.mxu2  ;;  %v5931_v8 = vpop.f32.mrf.mxu0 }
 0x258   :  { %6194 = vmatpush.bf16.msra.mxu1 %v9412_v50  ;;  %v5956_v5 = vadd.f32 %v5955_v4, %v5943_v63  ;;  %v5968_v7 = vpop.f32.mrf.mxu3  ;;  %v5944_v11 = vpop.f32.mrf.mxu1  ;;  %v154_v63 = vld [vmem:[#allocation2 + $0x260] sm:$0xff] }
 0x259   :  { %6207 = vmatpush.bf16.msra.mxu2 %v9420_v51  ;;  %v235_v51 = vpack.c.bf16 %v156_v46, %v156_v46 }
 0x25a   :  { %6220 = vmatpush.bf16.msra.mxu3 %v9428_v52  ;;  %v5969_v9 = vadd.f32 %v5968_v7, %v5956_v5 }
 0x25b   :  { %6182 = vmatpush.bf16.msra.mxu0 %v9403_v53 }
 0x25c   :  { %6195 = vmatpush.bf16.msra.mxu1 %v9411_v54 }
 0x25d   :  { %6208 = vmatpush.bf16.msra.mxu2 %v9419_v55  ;;  %v9432_v55 = vld [vmem:[#allocation4 + $0x1310] sm:$0xff] }
 0x25e   :  { %6221 = vmatpush.bf16.msra.mxu3 %v9427_v56 }
 0x25f   :  { %6183 = vmatpush.bf16.msra.mxu0 %v9402_v59  ;;  %v5957_v18 = vpop.f32.mrf.mxu2  ;;  %v9439_v59 = vld [vmem:[#allocation4 + $0x1348] sm:$0xff] }
 0x260   :  { %6196 = vmatpush.bf16.msra.mxu1 %v9410_v61  ;;  %v5970_v20 = vpop.f32.mrf.mxu3 }
 0x261   :  { %6209 = vmatpush.bf16.msra.mxu2 %v9418_v62  ;;  %v9430_v62 = vld [vmem:[#allocation4 + $0x1300] sm:$0xff] }
 0x262   :  { %6222 = vmatpush.bf16.msra.mxu3 %v9426_v0  ;;  %v9438_v0 = vld [vmem:[#allocation4 + $0x1340] sm:$0xff] }
 0x263   :  { %6184 = vmatpush.bf16.msra.mxu0 %v9401_v1  ;;  %v155_v1 = vld [vmem:[#allocation2 + $0x268] sm:$0xff] }
 0x264   :  { %6197 = vmatpush.bf16.msra.mxu1 %v9409_v2  ;;  %v233_v2 = vpack.c.bf16 %v154_v63, %v154_v63 }
 0x265   :  { %6210 = vmatpush.bf16.msra.mxu2 %v9417_v3  ;;  %v234_v3 = vpack.c.bf16 %v155_v1, %v155_v1 }
 0x266   :  { %6223 = vmatpush.bf16.msra.mxu3 %v9425_v6 }
 0x267   :  { %6185 = vmatpush.bf16.msra.mxu0 %v9400_v10 }
 0x268   :  { %6198 = vmatpush.bf16.msra.mxu1 %v9408_v12 }
 0x269   :  { %6211 = vmatpush.bf16.msra.mxu2 %v9416_v13 }
 0x26a   :  { %6224 = vmatpush.bf16.msra.mxu3 %v9424_v14 }
 0x26b   :  { %6186 = vmatpush.bf16.msra.mxu0 %v9399_v15 }
 0x26c   :  { %6199 = vmatpush.bf16.msra.mxu1 %v9407_v16 }
 0x26d   :  { %6212 = vmatpush.bf16.msra.mxu2 %v9415_v17 }
 0x26e   :  { %6225 = vmatpush.bf16.msra.mxu3 %v9423_v19 }
 0x26f   :  { %6187 = vmatpush.bf16.msra.mxu0 %v9398_v21  ;;  %v5981_v40 = vpop.f32.mrf.mxu0 }
 0x270   :  { %6200 = vmatpush.bf16.msra.mxu1 %v9406_v22  ;;  %v5982_v41 = vadd.f32 %v5981_v40, %v5969_v9  ;;  %v5994_v43 = vpop.f32.mrf.mxu1 }
 0x271   :  { %6213 = vmatpush.bf16.msra.mxu2 %v9414_v24 }
 0x272   :  { %6226 = vmatpush.bf16.msra.mxu3 %v9422_v29  ;;  %6188 = vmatmul.bf16.vlgmr.msra.gmra.mxu0 %v229_v30  ;;  %v5995_v45 = vadd.f32 %v5994_v43, %v5982_v41  ;;  %v6286_v30 = vld [vmem:[%s9692_s3 + $0x70] sm:$0xff]  ;;  %v6280_v41 = vld [vmem:[%s9692_s3 + $0x40] sm:$0xff] }
 0x273   :  { %6232 = vmatpush.bf16.msrb.mxu0 %v9437_v27  ;;  %6201 = vmatmul.bf16.vlgmr.msra.gmra.mxu1 %v230_v33  ;;  %v6278_v43 = vld [vmem:[%s9692_s3 + $0x30] sm:$0xff] }
 0x274   :  { %6245 = vmatpush.bf16.msrb.mxu1 %v9445_v28  ;;  %6214 = vmatmul.bf16.vlgmr.msra.gmra.mxu2 %v231_v32  ;;  %v6287_v28 = vld [vmem:[%s9692_s3 + $0x78] sm:$0xff] }
 0x275   :  { %6265 = vmatpush.bf16.msrb.mxu2 %v9446_v34  ;;  %6227 = vmatmul.bf16.vlgmr.msra.gmra.mxu3 %v232_v35  ;;  %v6284_v35 = vld [vmem:[%s9692_s3 + $0x60] sm:$0xff] }
 0x276   :  { %6292 = vmatpush.msrb.mxu3 %v6287_v28 }
 0x277   :  { %6233 = vmatpush.bf16.msrb.mxu0 %v9436_v36  ;;  %v6007_v49 = vpop.f32.mrf.mxu2  ;;  %v5983_v53 = vpop.f32.mrf.mxu0  ;;  %v6283_v36 = vld [vmem:[%s9692_s3 + $0x58] sm:$0xff] }
 0x278   :  { %6246 = vmatpush.bf16.msrb.mxu1 %v9444_v37  ;;  %v6008_v50 = vadd.f32 %v6007_v49, %v5995_v45  ;;  %v6020_v52 = vpop.f32.mrf.mxu3  ;;  %v5996_v56 = vpop.f32.mrf.mxu1  ;;  %6293 = vmatpush.msrb.mxu3 %v6286_v30  ;;  %v6282_v37 = vld [vmem:[%s9692_s3 + $0x50] sm:$0xff]  ;;  %v6276_v45 = vld [vmem:[%s9692_s3 + $0x20] sm:$0xff] }
 0x279   :  { %v6272_v53 = vld [vmem:[%s9692_s3] sm:$0xff] }
 0x27a   :  { %v6021_v54 = vadd.f32 %v6020_v52, %v6008_v50  ;;  %6294 = vmatpush.msrb.mxu3 %v6285_v31  ;;  %v6274_v50 = vld [vmem:[%s9692_s3 + $0x10] sm:$0xff] }
 0x27b   :  { %6234 = vmatpush.bf16.msrb.mxu0 %v9435_v38 }
 0x27c   :  { %6247 = vmatpush.bf16.msrb.mxu1 %v9443_v39  ;;  %6295 = vmatpush.msrb.mxu3 %v6284_v35  ;;  %v6281_v39 = vld [vmem:[%s9692_s3 + $0x48] sm:$0xff] }
 0x27e   :  { %6296 = vmatpush.msrb.mxu3 %v6283_v36 }
 0x27f   :  { %6235 = vmatpush.bf16.msrb.mxu0 %v9434_v42  ;;  %v6009_v60 = vpop.f32.mrf.mxu2  ;;  %v6279_v42 = vld [vmem:[%s9692_s3 + $0x38] sm:$0xff] }
 0x280   :  { %6248 = vmatpush.bf16.msrb.mxu1 %v9442_v44  ;;  %v6022_v61 = vpop.f32.mrf.mxu3  ;;  %6297 = vmatpush.msrb.mxu3 %v6282_v37  ;;  %v6277_v44 = vld [vmem:[%s9692_s3 + $0x28] sm:$0xff] }
 0x282   :  { %6298 = vmatpush.msrb.mxu3 %v6281_v39 }
 0x283   :  { %6236 = vmatpush.bf16.msrb.mxu0 %v9433_v47  ;;  %v6275_v47 = vld [vmem:[%s9692_s3 + $0x18] sm:$0xff] }
 0x284   :  { %6249 = vmatpush.bf16.msrb.mxu1 %v9441_v48  ;;  %8821 = vmatmul.msk.bf16.vlgmr.msrb.gmra.mxu2 %vm5240_vm0, %v235_v51  ;;  %v6273_v51 = vld [vmem:[%s9692_s3 + $0x8] sm:$0xff] }
 0x285   :  { %6299 = vmatpush.msrb.mxu3 %v6280_v41 }
 0x287   :  { %6237 = vmatpush.bf16.msrb.mxu0 %v9432_v55  ;;  %6300 = vmatpush.msrb.mxu3 %v6279_v42 }
 0x288   :  { %6250 = vmatpush.bf16.msrb.mxu1 %v9440_v57 }
 0x289   :  { %6301 = vmatpush.msrb.mxu3 %v6278_v43 }
 0x28b   :  { %6238 = vmatpush.bf16.msrb.mxu0 %v9431_v58  ;;  %6302 = vmatpush.msrb.mxu3 %v6277_v44 }
 0x28c   :  { %6251 = vmatpush.bf16.msrb.mxu1 %v9439_v59 }
 0x28d   :  { %6303 = vmatpush.msrb.mxu3 %v6276_v45 }
 0x28f   :  { %6239 = vmatpush.bf16.msrb.mxu0 %v9430_v62  ;;  %v6033_v4 = vpop.f32.mrf.mxu0  ;;  %6304 = vmatpush.msrb.mxu3 %v6275_v47 }
 0x290   :  { %6252 = vmatpush.bf16.msrb.mxu1 %v9438_v0  ;;  %v6034_v5 = vadd.f32 %v6033_v4, %v6021_v54  ;;  %v6046_v6 = vpop.f32.mrf.mxu1 }
 0x291   :  { %6305 = vmatpush.msrb.mxu3 %v6274_v50 }
 0x292   :  { %6240 = vmatmul.bf16.vlgmr.msrb.gmra.mxu0 %v233_v2  ;;  %v6047_v7 = vadd.f32 %v6046_v6, %v6034_v5 }
 0x293   :  { %6253 = vmatmul.bf16.vlgmr.msrb.gmra.mxu1 %v234_v3  ;;  %6306 = vmatpush.msrb.mxu3 %v6273_v51 }
 0x295   :  { %6307 = vmatpush.msrb.mxu3 %v6272_v53 }
 0x297   :  { %v6059_v8 = vpop.f32.mrf.mxu2  ;;  %v6035_v11 = vpop.f32.mrf.mxu0 }
 0x298   :  { %v6060_v9 = vadd.f32 %v6059_v8, %v6047_v7  ;;  %v6072_v10 = vpop.f32.mrf.mxu3  ;;  %v6048_v13 = vpop.f32.mrf.mxu1 }
 0x29a   :  { %v6073_v12 = vadd.f32 %v6072_v10, %v6060_v9 }
 0x29f   :  { %v6061_v14 = vpop.f32.mrf.mxu2 }
 0x2a0   :  { %v6074_v15 = vpop.f32.mrf.mxu3  ;;  %v9454_v14 = vld [vmem:[#allocation7] ss:$0 sm:$0xff] }
 0x2af   :  { %v6085_v16 = vpop.f32.mrf.mxu0 }
 0x2b0   :  { %v6086_v17 = vadd.f32 %v6085_v16, %v6073_v12  ;;  %v6098_v18 = vpop.f32.mrf.mxu1 }
 0x2b2   :  { %v6099_v19 = vadd.f32 %v6098_v18, %v6086_v17 }
 0x2b7   :  { %v6111_v20 = vpop.f32.mrf.mxu2  ;;  %v6087_v22 = vpop.f32.mrf.mxu0 }
 0x2b8   :  { %v6124_v21 = vpop.f32.mrf.mxu3  ;;  %v6100_v23 = vpop.f32.mrf.mxu1  ;;  %v6112_v48 = vadd.f32 %v6111_v20, %v6099_v19 }
 0x2ba   :  { %v6125_v52 = vadd.f32 %v6124_v21, %v6112_v48 }
 0x2bf   :  { %v6113_v24 = vpop.f32.mrf.mxu2 }
 0x2c0   :  { %v6126_v25 = vpop.f32.mrf.mxu3 }
 0x2cf   :  { %v6137_v26 = vpop.f32.mrf.mxu0 }
 0x2d0   :  { %v6150_v27 = vpop.f32.mrf.mxu1  ;;  %v6138_v54 = vadd.f32 %v6137_v26, %v6125_v52 }
 0x2d2   :  { %v6151_v59 = vadd.f32 %v6150_v27, %v6138_v54 }
 0x2d7   :  { %v6163_v29 = vpop.f32.mrf.mxu2  ;;  %v6139_v33 = vpop.f32.mrf.mxu0 }
 0x2d8   :  { %v6176_v32 = vpop.f32.mrf.mxu3  ;;  %v6152_v34 = vpop.f32.mrf.mxu1  ;;  %v6164_v60 = vadd.f32 %v6163_v29, %v6151_v59 }
 0x2da   :  { %v6177_v62 = vadd.f32 %v6176_v32, %v6164_v60 }
 0x2df   :  { %v6165_v38 = vpop.f32.mrf.mxu2 }
 0x2e0   :  { %v6178_v40 = vpop.f32.mrf.mxu3 }
 0x2ef   :  { %v6189_v46 = vpop.f32.mrf.mxu0 }
 0x2f0   :  { %v6202_v49 = vpop.f32.mrf.mxu1  ;;  %v6190_v0 = vadd.f32 %v6189_v46, %v6177_v62 }
 0x2f2   :  { %v6203_v1 = vadd.f32 %v6202_v49, %v6190_v0 }
 0x2f7   :  { %v6215_v55 = vpop.f32.mrf.mxu2  ;;  %v6191_v56 = vpop.f32.mrf.mxu0 }
 0x2f8   :  { %v6228_v57 = vpop.f32.mrf.mxu3  ;;  %v6204_v58 = vpop.f32.mrf.mxu1  ;;  %v6216_v3 = vadd.f32 %v6215_v55, %v6203_v1 }
 0x2fa   :  { %v6229_v4 = vadd.f32 %v6228_v57, %v6216_v3 }
 0x2ff   :  { %v6217_v61 = vpop.f32.mrf.mxu2 }
 0x300   :  { %v6230_v63 = vpop.f32.mrf.mxu3 }
 0x307   :  { %v6267_v2 = vpop.f32.mrf.mxu2 }
 0x30f   :  { %v6241_v5 = vpop.f32.mrf.mxu0  ;;  %v6269_v8 = vpop.f32.mrf.mxu2 }
 0x310   :  { %v6242_v6 = vadd.f32 %v6241_v5, %v6229_v4  ;;  %v6254_v7 = vpop.f32.mrf.mxu1 }
 0x312   :  { %v6255_v9 = vadd.f32 %v6254_v7, %v6242_v6 }
 0x314   :  { %v6268_v10 = vadd.f32 %v6267_v2, %v6255_v9 }
 0x316   :  { %v6271_v11 = vmax.f32 %v6268_v10, 0.0 }
 0x317   :  { %v6243_v12 = vpop.f32.mrf.mxu0 }
 0x318   :  { %v6256_v13 = vpop.f32.mrf.mxu1  ;;  %6308 = vmatmul.f32.vlgmr.msrb.gmra.mxu3 %v6271_v11 }
 0x39b   :  { %v6309_v15 = vpop.f32.mrf.mxu3 }
 0x39c   :  { %v6310_v16 = vadd.f32 %v9454_v14, %v6309_v15 }
 0x39e   :  { %6313 = vst.msk [vmem:[%s9694_s5] sm:$0xff] %vm6312_vm1, %v6310_v16 }
 0x39f   :  { %6318 = vsyncpa [#allocation3], 1 }
 0x3a0   :  { %6319 = vsyncpa [#allocation5], 1 }
 0x3a1   :  { %6320 = vsyncpa [#allocation8], 1 }

</bundles_post_ra>
